<compile_context>
chip_gen: v6e
topology: v6e:2x2x1
jax: 0.10.0
libtpu: 0.0.40
codegen_flags: <defaults>
</compile_context>

<pallas_src>
import functools
import math

import jax
import jax.numpy as jnp
from jax import lax
from jax.experimental import pallas as pl
from jax.experimental.pallas import tpu as pltpu

H2 = 2048        # hard-coded hidden width (2 * 1024) in the PyTorch module
EPS = 1e-5       # nn.BatchNorm1d default eps
LANE = 128       # TPU lane width


def _gelu_tanh(x):
    # nn.GELU(approximate='tanh'); tanh routes to the EUP (own VLIW slot).
    # Within ~3e-3 of the exact-erf nn.GELU() default.
    c = math.sqrt(2.0 / math.pi)
    return 0.5 * x * (1.0 + jnp.tanh(c * (x + 0.044715 * (x * x * x))))


def _batchnorm_train(x, gamma, beta):
    # Training-mode BatchNorm1d over the batch axis, folded into one FMA:
    # scale/shift are computed on the cheap (1, N) row path.
    mean = jnp.mean(x, axis=0, keepdims=True)
    var = jnp.mean(jnp.square(x - mean), axis=0, keepdims=True)
    scale = gamma * lax.rsqrt(var + EPS)
    shift = beta - mean * scale
    return x * scale + shift


def _mlp_kernel(x_ref, w1_ref, bn1_ref, w2_ref, bn2_ref, o_ref):
    # Grid axis 0 = hidden-dim (H2) reduction blocks.
    k = pl.program_id(0)

    @pl.when(k == 0)
    def _init():
        o_ref[...] = jnp.zeros_like(o_ref)

    # ---- Linear1 hidden block (bf16 operands, f32 accumulation) ----
    h = jnp.dot(x_ref[...], w1_ref[...],
                preferred_element_type=jnp.float32) + bn1_ref[0:1, :]
    h = _gelu_tanh(h)
    # BN1 is per hidden feature over the (whole, untiled) batch, so computing
    # its statistics per hidden block is exact.
    h = _batchnorm_train(h, bn1_ref[1:2, :], bn1_ref[2:3, :])

    # ---- Accumulate this hidden block's contribution to Linear2 ----
    o_ref[...] += jnp.dot(h.astype(jnp.bfloat16), w2_ref[...],
                          preferred_element_type=jnp.float32)

    @pl.when(k == pl.num_programs(0) - 1)
    def _finalize():
        y = o_ref[...] + bn2_ref[0:1, :]
        y = _gelu_tanh(y)
        o_ref[...] = _batchnorm_train(y, bn2_ref[1:2, :], bn2_ref[2:3, :])


def _pad_to(a, axis, mult):
    pad = (-a.shape[axis]) % mult
    if pad == 0:
        return a
    widths = [(0, 0)] * a.ndim
    widths[axis] = (0, pad)
    return jnp.pad(a, widths)


def init_params(key, input_size, embedding_dim):
    """PyTorch-default-style init; weights stored pre-transposed, in bf16."""
    k1, k2, k3, k4 = jax.random.split(key, 4)
    lim1 = 1.0 / math.sqrt(input_size)
    lim2 = 1.0 / math.sqrt(H2)
    return dict(
        w1=jax.random.uniform(k1, (input_size, H2), jnp.float32,
                              -lim1, lim1).astype(jnp.bfloat16),
        b1=jax.random.uniform(k2, (1, H2), jnp.float32, -lim1, lim1),
        gamma1=jnp.ones((1, H2), jnp.float32),
        beta1=jnp.zeros((1, H2), jnp.float32),
        w2=jax.random.uniform(k3, (H2, embedding_dim), jnp.float32,
                              -lim2, lim2).astype(jnp.bfloat16),
        b2=jax.random.uniform(k4, (1, embedding_dim), jnp.float32,
                              -lim2, lim2),
        gamma2=jnp.ones((1, embedding_dim), jnp.float32),
        beta2=jnp.zeros((1, embedding_dim), jnp.float32),
    )


@functools.partial(jax.jit, static_argnames=("tk",))
def mlp_forward(x, params, *, tk=1024):
    """Full MLP forward in one pipelined pallas_call.

    Grid = (hidden-dim reduction blocks,) — w1 is streamed exactly once and
    the lane-dense padded output stays resident in VMEM as the accumulator.
    The batch axis is never tiled so BatchNorm statistics stay exact.
    """
    b, _ = x.shape
    emb = params["w2"].shape[1]
    assert H2 % tk == 0
    k_blocks = H2 // tk

    # Lane-dense zero padding (exact for both matmuls; sliced off afterwards).
    # gamma2/beta2/b2 padded with zeros => padded output columns are exactly 0.
    xb = _pad_to(x.astype(jnp.bfloat16), 1, LANE)
    w1 = _pad_to(params["w1"], 0, LANE)
    w2 = _pad_to(params["w2"], 1, LANE)
    kp = xb.shape[1]
    np_ = w2.shape[1]

    # Pack bias/gamma/beta trios into single arrays (one DMA each per step).
    bn1 = jnp.concatenate(
        [params["b1"], params["gamma1"], params["beta1"]], axis=0)      # (3, H2)
    bn2 = jnp.concatenate(
        [_pad_to(params["b2"], 1, LANE),
         _pad_to(params["gamma2"], 1, LANE),
         _pad_to(params["beta2"], 1, LANE)], axis=0)                    # (3, np_)

    flops = 2 * b * (kp * H2 + H2 * np_)
    bytes_accessed = (2 * xb.size + 2 * w1.size + 2 * w2.size
                      + 4 * (bn1.size + bn2.size) + 4 * b * np_)

    out = pl.pallas_call(
        _mlp_kernel,
        out_shape=jax.ShapeDtypeStruct((b, np_), jnp.float32),
        grid_spec=pltpu.PrefetchScalarGridSpec(
            num_scalar_prefetch=0,
            grid=(k_blocks,),
            in_specs=[
                pl.BlockSpec((b, kp), lambda k: (0, 0)),     # x (VMEM-resident)
                pl.BlockSpec((kp, tk), lambda k: (0, k)),    # w1 hidden block
                pl.BlockSpec((3, tk), lambda k: (0, k)),     # b1/gamma1/beta1
                pl.BlockSpec((tk, np_), lambda k: (k, 0)),   # w2 hidden block
                pl.BlockSpec((3, np_), lambda k: (0, 0)),    # b2/gamma2/beta2
            ],
            out_specs=pl.BlockSpec((b, np_), lambda k: (0, 0)),  # resident acc
        ),
        compiler_params=pltpu.CompilerParams(
            dimension_semantics=("arbitrary",),
            vmem_limit_bytes=32 * 1024 * 1024),
        cost_estimate=pl.CostEstimate(
            flops=flops,
            transcendentals=b * (H2 + np_),
            bytes_accessed=bytes_accessed),
    )(xb, w1, bn1, w2, bn2)

    return out[:, :emb]


def mlp_reference(x, params):
    """Pure-JAX reference with the same precision/activation choices."""
    h = jnp.dot(x.astype(jnp.bfloat16), params["w1"],
                preferred_element_type=jnp.float32) + params["b1"]
    h = _gelu_tanh(h)
    h = _batchnorm_train(h, params["gamma1"], params["beta1"])
    y = jnp.dot(h.astype(jnp.bfloat16), params["w2"],
                preferred_element_type=jnp.float32) + params["b2"]
    y = _gelu_tanh(y)
    y = _batchnorm_train(y, params["gamma2"], params["beta2"])
    return y


if __name__ == "__main__":
    batch = 8
    input_size = 32
    embedding_dim = 32

    key = jax.random.PRNGKey(0)
    kx, kparams = jax.random.split(key)
    x = jax.random.normal(kx, (batch, input_size), dtype=jnp.float32)
    params = init_params(kparams, input_size, embedding_dim)

    out = mlp_forward(x, params)
    out = jax.block_until_ready(out)

    assert out.shape == (batch, embedding_dim)
    assert bool(jnp.all(jnp.isfinite(out)))
    ref = mlp_reference(x, params)
    max_err = float(jnp.max(jnp.abs(out - ref)))
    assert max_err < 2e-2, max_err
    print("KERNEL_OK")
</pallas_src>

<mosaic_0001>
module attributes {stable_mosaic.version = 11 : i64} {
  func.func @_mlp_kernel(%arg0: i32, %arg1: memref<8x128xbf16, #tpu.memory_space<vmem>>, %arg2: memref<128x1024xbf16, #tpu.memory_space<vmem>>, %arg3: memref<3x1024xf32, #tpu.memory_space<vmem>>, %arg4: memref<1024x128xbf16, #tpu.memory_space<vmem>>, %arg5: memref<3x128xf32, #tpu.memory_space<vmem>>, %arg6: memref<8x128xf32, #tpu.memory_space<vmem>>) attributes {dimension_semantics = [#tpu.dimension_semantics<arbitrary>], iteration_bounds = array<i64: 2>, scalar_prefetch = 0 : i64, scratch_operands = 0 : i64, tpu.core_type = #tpu.core_type<tc>, window_params = [{pipeline_mode = #tpu.pipeline_mode<synchronous>, transform_indices = @transform_0, window_bounds = array<i64: 8, 128>}, {transform_indices = @transform_1, window_bounds = array<i64: 128, 1024>}, {transform_indices = @transform_2, window_bounds = array<i64: 3, 1024>}, {transform_indices = @transform_3, window_bounds = array<i64: 1024, 128>}, {pipeline_mode = #tpu.pipeline_mode<synchronous>, transform_indices = @transform_4, window_bounds = array<i64: 3, 128>}, {pipeline_mode = #tpu.pipeline_mode<synchronous>, transform_indices = @transform_5, window_bounds = array<i64: 8, 128>}]} {
    %c0_i32 = arith.constant 0 : i32
    %0 = arith.cmpi eq, %arg0, %c0_i32 : i32
    %1 = arith.extui %0 : i1 to i32
    %c0_i32_0 = arith.constant 0 : i32
    %2 = arith.cmpi ne, %1, %c0_i32_0 : i32
    scf.if %2 {
      %cst_25 = arith.constant 0.000000e+00 : f32
      %54 = vector.broadcast %cst_25 : f32 to vector<8x128xf32>
      %c0_26 = arith.constant 0 : index
      %c0_27 = arith.constant 0 : index
      %55 = vector.load %arg6[%c0_26, %c0_27] : memref<8x128xf32, #tpu.memory_space<vmem>>, vector<8x128xf32>
      tpu.vector_store %arg6[%c0_26, %c0_27], %54 {strides = array<i32>} : memref<8x128xf32, #tpu.memory_space<vmem>>, vector<8x128xf32>,
    } else {
    }
    %c0 = arith.constant 0 : index
    %c0_1 = arith.constant 0 : index
    %3 = vector.load %arg1[%c0, %c0_1] : memref<8x128xbf16, #tpu.memory_space<vmem>>, vector<8x128xbf16>
    %c0_2 = arith.constant 0 : index
    %c0_3 = arith.constant 0 : index
    %4 = vector.load %arg2[%c0_2, %c0_3] : memref<128x1024xbf16, #tpu.memory_space<vmem>>, vector<128x1024xbf16>
    %cst = arith.constant dense<0.000000e+00> : vector<8x1024xf32>
    %5 = tpu.matmul %3, %4, %cst {dimension_numbers = #tpu.dot_dimension_numbers<[1], [0], [0], [1], [0, 0, 1, 1], [], []>} : vector<8x128xbf16>, vector<128x1024xbf16>, vector<8x1024xf32> -> vector<8x1024xf32>
    %c0_4 = arith.constant 0 : index
    %c0_5 = arith.constant 0 : index
    %6 = vector.load %arg3[%c0_4, %c0_5] : memref<3x1024xf32, #tpu.memory_space<vmem>>, vector<1x1024xf32>
    %7 = vector.broadcast %6 : vector<1x1024xf32> to vector<8x1024xf32>
    %8 = arith.addf %5, %7 : vector<8x1024xf32>
    %cst_6 = arith.constant 5.000000e-01 : f32
    %9 = vector.broadcast %cst_6 : f32 to vector<8x1024xf32>
    %10 = arith.mulf %9, %8 : vector<8x1024xf32>
    %11 = arith.mulf %8, %8 : vector<8x1024xf32>
    %12 = arith.mulf %11, %8 : vector<8x1024xf32>
    %cst_7 = arith.constant 4.471500e-02 : f32
    %13 = vector.broadcast %cst_7 : f32 to vector<8x1024xf32>
    %14 = arith.mulf %13, %12 : vector<8x1024xf32>
    %15 = arith.addf %8, %14 : vector<8x1024xf32>
    %cst_8 = arith.constant 0.797884583 : f32
    %16 = vector.broadcast %cst_8 : f32 to vector<8x1024xf32>
    %17 = arith.mulf %16, %15 : vector<8x1024xf32>
    %18 = math.tanh %17 : vector<8x1024xf32>
    %cst_9 = arith.constant 1.000000e+00 : f32
    %19 = vector.broadcast %cst_9 : f32 to vector<8x1024xf32>
    %20 = arith.addf %19, %18 : vector<8x1024xf32>
    %21 = arith.mulf %10, %20 : vector<8x1024xf32>
    %c1 = arith.constant 1 : index
    %c0_10 = arith.constant 0 : index
    %22 = vector.load %arg3[%c1, %c0_10] : memref<3x1024xf32, #tpu.memory_space<vmem>>, vector<1x1024xf32>
    %c2 = arith.constant 2 : index
    %c0_11 = arith.constant 0 : index
    %23 = vector.load %arg3[%c2, %c0_11] : memref<3x1024xf32, #tpu.memory_space<vmem>>, vector<1x1024xf32>
    %cst_12 = arith.constant dense<0.000000e+00> : vector<1024xf32>
    %24 = vector.multi_reduction <add>, %21, %cst_12 [0] : vector<8x1024xf32> to vector<1024xf32>
    %25 = vector.shape_cast %24 : vector<1024xf32> to vector<1x1024xf32>
    %cst_13 = arith.constant 8.000000e+00 : f32
    %26 = vector.broadcast %cst_13 : f32 to vector<1x1024xf32>
    %27 = arith.divf %25, %26 : vector<1x1024xf32>
    %28 = vector.broadcast %27 : vector<1x1024xf32> to vector<8x1024xf32>
    %29 = arith.subf %21, %28 : vector<8x1024xf32>
    %30 = arith.mulf %29, %29 : vector<8x1024xf32>
    %cst_14 = arith.constant dense<0.000000e+00> : vector<1024xf32>
    %31 = vector.multi_reduction <add>, %30, %cst_14 [0] : vector<8x1024xf32> to vector<1024xf32>
    %32 = vector.shape_cast %31 : vector<1024xf32> to vector<1x1024xf32>
    %cst_15 = arith.constant 8.000000e+00 : f32
    %33 = vector.broadcast %cst_15 : f32 to vector<1x1024xf32>
    %34 = arith.divf %32, %33 : vector<1x1024xf32>
    %cst_16 = arith.constant 9.99999974E-6 : f32
    %35 = vector.broadcast %cst_16 : f32 to vector<1x1024xf32>
    %36 = arith.addf %34, %35 : vector<1x1024xf32>
    %37 = math.rsqrt %36 : vector<1x1024xf32>
    %38 = arith.mulf %22, %37 : vector<1x1024xf32>
    %39 = arith.mulf %27, %38 : vector<1x1024xf32>
    %40 = arith.subf %23, %39 : vector<1x1024xf32>
    %41 = vector.broadcast %38 : vector<1x1024xf32> to vector<8x1024xf32>
    %42 = arith.mulf %21, %41 : vector<8x1024xf32>
    %43 = vector.broadcast %40 : vector<1x1024xf32> to vector<8x1024xf32>
    %44 = arith.addf %42, %43 : vector<8x1024xf32>
    %c0_17 = arith.constant 0 : index
    %c0_18 = arith.constant 0 : index
    %45 = vector.load %arg6[%c0_17, %c0_18] : memref<8x128xf32, #tpu.memory_space<vmem>>, vector<8x128xf32>
    %46 = arith.truncf %44 : vector<8x1024xf32> to vector<8x1024xbf16>
    %c0_19 = arith.constant 0 : index
    %c0_20 = arith.constant 0 : index
    %47 = vector.load %arg4[%c0_19, %c0_20] : memref<1024x128xbf16, #tpu.memory_space<vmem>>, vector<1024x128xbf16>
    %cst_21 = arith.constant dense<0.000000e+00> : vector<8x128xf32>
    %48 = tpu.matmul %46, %47, %cst_21 {dimension_numbers = #tpu.dot_dimension_numbers<[1], [0], [0], [1], [0, 0, 1, 1], [], []>} : vector<8x1024xbf16>, vector<1024x128xbf16>, vector<8x128xf32> -> vector<8x128xf32>
    %49 = arith.addf %45, %48 : vector<8x128xf32>
    %c0_22 = arith.constant 0 : index
    %c0_23 = arith.constant 0 : index
    %50 = vector.load %arg6[%c0_22, %c0_23] : memref<8x128xf32, #tpu.memory_space<vmem>>, vector<8x128xf32>
    tpu.vector_store %arg6[%c0_22, %c0_23], %49 {strides = array<i32>} : memref<8x128xf32, #tpu.memory_space<vmem>>, vector<8x128xf32>,
    %c1_i32 = arith.constant 1 : i32
    %51 = arith.cmpi eq, %arg0, %c1_i32 : i32
    %52 = arith.extui %51 : i1 to i32
    %c0_i32_24 = arith.constant 0 : i32
    %53 = arith.cmpi ne, %52, %c0_i32_24 : i32
    scf.if %53 {
      %c0_25 = arith.constant 0 : index
      %c0_26 = arith.constant 0 : index
      %54 = vector.load %arg6[%c0_25, %c0_26] : memref<8x128xf32, #tpu.memory_space<vmem>>, vector<8x128xf32>
      %c0_27 = arith.constant 0 : index
      %c0_28 = arith.constant 0 : index
      %55 = vector.load %arg5[%c0_27, %c0_28] : memref<3x128xf32, #tpu.memory_space<vmem>>, vector<1x128xf32>
      %56 = vector.broadcast %55 : vector<1x128xf32> to vector<8x128xf32>
      %57 = arith.addf %54, %56 : vector<8x128xf32>
      %cst_29 = arith.constant 5.000000e-01 : f32
      %58 = vector.broadcast %cst_29 : f32 to vector<8x128xf32>
      %59 = arith.mulf %58, %57 : vector<8x128xf32>
      %60 = arith.mulf %57, %57 : vector<8x128xf32>
      %61 = arith.mulf %60, %57 : vector<8x128xf32>
      %cst_30 = arith.constant 4.471500e-02 : f32
      %62 = vector.broadcast %cst_30 : f32 to vector<8x128xf32>
      %63 = arith.mulf %62, %61 : vector<8x128xf32>
      %64 = arith.addf %57, %63 : vector<8x128xf32>
      %cst_31 = arith.constant 0.797884583 : f32
      %65 = vector.broadcast %cst_31 : f32 to vector<8x128xf32>
      %66 = arith.mulf %65, %64 : vector<8x128xf32>
      %67 = math.tanh %66 : vector<8x128xf32>
      %cst_32 = arith.constant 1.000000e+00 : f32
      %68 = vector.broadcast %cst_32 : f32 to vector<8x128xf32>
      %69 = arith.addf %68, %67 : vector<8x128xf32>
      %70 = arith.mulf %59, %69 : vector<8x128xf32>
      %c1_33 = arith.constant 1 : index
      %c0_34 = arith.constant 0 : index
      %71 = vector.load %arg5[%c1_33, %c0_34] : memref<3x128xf32, #tpu.memory_space<vmem>>, vector<1x128xf32>
      %c2_35 = arith.constant 2 : index
      %c0_36 = arith.constant 0 : index
      %72 = vector.load %arg5[%c2_35, %c0_36] : memref<3x128xf32, #tpu.memory_space<vmem>>, vector<1x128xf32>
      %cst_37 = arith.constant dense<0.000000e+00> : vector<128xf32>
      %73 = vector.multi_reduction <add>, %70, %cst_37 [0] : vector<8x128xf32> to vector<128xf32>
      %74 = vector.shape_cast %73 : vector<128xf32> to vector<1x128xf32>
      %cst_38 = arith.constant 8.000000e+00 : f32
      %75 = vector.broadcast %cst_38 : f32 to vector<1x128xf32>
      %76 = arith.divf %74, %75 : vector<1x128xf32>
      %77 = vector.broadcast %76 : vector<1x128xf32> to vector<8x128xf32>
      %78 = arith.subf %70, %77 : vector<8x128xf32>
      %79 = arith.mulf %78, %78 : vector<8x128xf32>
      %cst_39 = arith.constant dense<0.000000e+00> : vector<128xf32>
      %80 = vector.multi_reduction <add>, %79, %cst_39 [0] : vector<8x128xf32> to vector<128xf32>
      %81 = vector.shape_cast %80 : vector<128xf32> to vector<1x128xf32>
      %cst_40 = arith.constant 8.000000e+00 : f32
      %82 = vector.broadcast %cst_40 : f32 to vector<1x128xf32>
      %83 = arith.divf %81, %82 : vector<1x128xf32>
      %cst_41 = arith.constant 9.99999974E-6 : f32
      %84 = vector.broadcast %cst_41 : f32 to vector<1x128xf32>
      %85 = arith.addf %83, %84 : vector<1x128xf32>
      %86 = math.rsqrt %85 : vector<1x128xf32>
      %87 = arith.mulf %71, %86 : vector<1x128xf32>
      %88 = arith.mulf %76, %87 : vector<1x128xf32>
      %89 = arith.subf %72, %88 : vector<1x128xf32>
      %90 = vector.broadcast %87 : vector<1x128xf32> to vector<8x128xf32>
      %91 = arith.mulf %70, %90 : vector<8x128xf32>
      %92 = vector.broadcast %89 : vector<1x128xf32> to vector<8x128xf32>
      %93 = arith.addf %91, %92 : vector<8x128xf32>
      %c0_42 = arith.constant 0 : index
      %c0_43 = arith.constant 0 : index
      %94 = vector.load %arg6[%c0_42, %c0_43] : memref<8x128xf32, #tpu.memory_space<vmem>>, vector<8x128xf32>
      tpu.vector_store %arg6[%c0_42, %c0_43], %93 {strides = array<i32>} : memref<8x128xf32, #tpu.memory_space<vmem>>, vector<8x128xf32>,
    } else {
    }
    return
  }
  func.func @transform_0(%arg0: i32) -> (i32, i32) {
    %c0_i32 = arith.constant 0 : i32
    %c0_i32_0 = arith.constant 0 : i32
    %c0_i32_1 = arith.constant 0 : i32
    return %c0_i32, %c0_i32_0 : i32, i32
  }
  func.func @transform_1(%arg0: i32) -> (i32, i32) {
    %c0_i32 = arith.constant 0 : i32
    %c0_i32_0 = arith.constant 0 : i32
    return %c0_i32, %arg0 : i32, i32
  }
  func.func @transform_2(%arg0: i32) -> (i32, i32) {
    %c0_i32 = arith.constant 0 : i32
    %c0_i32_0 = arith.constant 0 : i32
    return %c0_i32, %arg0 : i32, i32
  }
  func.func @transform_3(%arg0: i32) -> (i32, i32) {
    %c0_i32 = arith.constant 0 : i32
    %c0_i32_0 = arith.constant 0 : i32
    return %arg0, %c0_i32 : i32, i32
  }
  func.func @transform_4(%arg0: i32) -> (i32, i32) {
    %c0_i32 = arith.constant 0 : i32
    %c0_i32_0 = arith.constant 0 : i32
    %c0_i32_1 = arith.constant 0 : i32
    return %c0_i32, %c0_i32_0 : i32, i32
  }
  func.func @transform_5(%arg0: i32) -> (i32, i32) {
    %c0_i32 = arith.constant 0 : i32
    %c0_i32_0 = arith.constant 0 : i32
    %c0_i32_1 = arith.constant 0 : i32
    return %c0_i32, %c0_i32_0 : i32, i32
  }
}

</mosaic_0001>

<bundles_post_ra>
// kernel: mlp_forward.1
= control target key start
LH: loop header
LB: loop body
LE: loop exit
PB: predicated region body
PF: predicated region fallthrough
CT: control target
= control target key end

     0   :  { %10 = vsyncpa [#allocation4], 0  ;;  %s2715_s18 = smov 0   ;;  %s2717_s19 = smov 0   ;;  %s3294_s0 = inlined_call_operand.vmem [shape: bf16[8,128], index: 0, kind: input, shape index: {}]   ;;  %s3295_s1 = inlined_call_operand.vmem [shape: bf16[128,2048], index: 1, kind: input, shape index: {}]   ;;  %s3296_s2 = inlined_call_operand.vmem [shape: f32[3,2048], index: 2, kind: input, shape index: {}]   ;;  %s3297_s3 = inlined_call_operand.vmem [shape: bf16[2048,128], index: 3, kind: input, shape index: {}]   ;;  %s3298_s4 = inlined_call_operand.vmem [shape: f32[3,128], index: 4, kind: input, shape index: {}]   ;;  %s3299_s5 = inlined_call_operand.hbm [shape: f32[8,128], index: 5, kind: output, shape index: {}]  }
   0x1   :  { %s2719_s20 = smov 0  }
   0x2 LB: > { %s2731_s21 = sadd.s32 4294967295, %s2679_s20   ;;  %s2734_s22 = sadd.s32 1, %s2679_s20   ;;  %s2679_s20 = sphi %s2719_s20, %s3302_s20   ;;  %s2675_s19 = sphi %s2717_s19, %s3301_s19   ;;  %s2671_s18 = sphi %s2715_s18, %s3300_s18  }
   0x3   : > { %s41_s23 = ssub.s32 %s2679_s20, %s2734_s22  ;;  %s44_s24 = sadd.s32 1, %s2675_s19 }
   0x4   : > { %p42_p0 = scmp.eq.s32.totalorder %s41_s23, 0  ;;  %p51_p1 = scmp.ne.s32.totalorder %s2675_s19, %s2671_s18 }
   0x5   : > { %p52_p2 = scmp.eq.s32.totalorder %s2679_s20, 0  ;;  %p2259_p4 = scmp.ge.s32.totalorder %s2679_s20, 2 }
   0x6   : > { %s2743_s25 = scalar_select %p42_p0, %s2675_s19, %s44_s24  }
   0x7   : > { %p53_p3 = por %p52_p2, %p51_p1  ;;  %177 = sbr.rel (%p2259_p4) target bundleno = 48 (0x30), region = 24 }
   0xc   : > { %180 = sbr.rel (!%p53_p3) target bundleno = 48 (0x30), region = 28  ;;  %s182_s26 = sand.u32 (%p53_p3), 1, %s2675_s19  }
   0xd   : > { %s2406_s27 = sshll.u32 (%p53_p3), %s2679_s20, 5  ;;  %s2260_s28 = sshll.u32 (%p53_p3), %s182_s26, 9 }
   0xe   : > { %s2751_s6 = scalar_lea.vmem (%p53_p3), %s3295_s1, %s2406_s27  ;;  %s2756_s7 = scalar_lea.vmem (%p53_p3), [#allocation2], %s2260_s28 }
   0xf   : > { %v200_v0 = vld [vmem:[%s2751_s6] sm:$0xff] (%p53_p3)  ;;  %v202_v1 = vld [vmem:[%s2751_s6 + $0x8] sm:$0xff] (%p53_p3)  ;;  %v204_v2 = vld [vmem:[%s2751_s6 + $0x10] sm:$0xff] (%p53_p3) }
  0x10   : > { %201 = vst [vmem:[%s2756_s7] sm:$0xff] (%p53_p3), %v200_v0  ;;  %203 = vst [vmem:[%s2756_s7 + $0x8] sm:$0xff] (%p53_p3), %v202_v1  ;;  %v206_v3 = vld [vmem:[%s2751_s6 + $0x18] sm:$0xff] (%p53_p3)  ;;  %v208_v4 = vld [vmem:[%s2751_s6 + $0x40] sm:$0xff] (%p53_p3) }
  0x11   : > { %205 = vst [vmem:[%s2756_s7 + $0x10] sm:$0xff] %v204_v2  ;;  %v210_v5 = vld [vmem:[%s2751_s6 + $0x48] sm:$0xff]  ;;  %207 = vst [vmem:[%s2756_s7 + $0x18] sm:$0xff] %v206_v3  ;;  %v212_v6 = vld [vmem:[%s2751_s6 + $0x50] sm:$0xff] }
  0x12   : > { %209 = vst [vmem:[%s2756_s7 + $0x20] sm:$0xff] %v208_v4  ;;  %211 = vst [vmem:[%s2756_s7 + $0x28] sm:$0xff] %v210_v5  ;;  %v214_v7 = vld [vmem:[%s2751_s6 + $0x58] sm:$0xff]  ;;  %v216_v8 = vld [vmem:[%s2751_s6 + $0x80] sm:$0xff] }
  0x13   : > { %213 = vst [vmem:[%s2756_s7 + $0x30] sm:$0xff] %v212_v6  ;;  %215 = vst [vmem:[%s2756_s7 + $0x38] sm:$0xff] %v214_v7  ;;  %v218_v9 = vld [vmem:[%s2751_s6 + $0x88] sm:$0xff]  ;;  %v220_v10 = vld [vmem:[%s2751_s6 + $0x90] sm:$0xff] }
  0x14   : > { %217 = vst [vmem:[%s2756_s7 + $0x40] sm:$0xff] %v216_v8  ;;  %v222_v11 = vld [vmem:[%s2751_s6 + $0x98] sm:$0xff]  ;;  %219 = vst [vmem:[%s2756_s7 + $0x48] sm:$0xff] %v218_v9  ;;  %v224_v12 = vld [vmem:[%s2751_s6 + $0xc0] sm:$0xff] }
  0x15   : > { %221 = vst [vmem:[%s2756_s7 + $0x50] sm:$0xff] %v220_v10  ;;  %223 = vst [vmem:[%s2756_s7 + $0x58] sm:$0xff] %v222_v11  ;;  %v226_v13 = vld [vmem:[%s2751_s6 + $0xc8] sm:$0xff]  ;;  %v228_v14 = vld [vmem:[%s2751_s6 + $0xd0] sm:$0xff] }
  0x16   : > { %225 = vst [vmem:[%s2756_s7 + $0x60] sm:$0xff] %v224_v12  ;;  %227 = vst [vmem:[%s2756_s7 + $0x68] sm:$0xff] %v226_v13  ;;  %v230_v15 = vld [vmem:[%s2751_s6 + $0xd8] sm:$0xff]  ;;  %v232_v16 = vld [vmem:[%s2751_s6 + $0x100] sm:$0xff] }
  0x17   : > { %229 = vst [vmem:[%s2756_s7 + $0x70] sm:$0xff] %v228_v14  ;;  %v234_v17 = vld [vmem:[%s2751_s6 + $0x108] sm:$0xff]  ;;  %231 = vst [vmem:[%s2756_s7 + $0x78] sm:$0xff] %v230_v15  ;;  %v236_v18 = vld [vmem:[%s2751_s6 + $0x110] sm:$0xff] }
  0x18   : > { %233 = vst [vmem:[%s2756_s7 + $0x80] sm:$0xff] %v232_v16  ;;  %235 = vst [vmem:[%s2756_s7 + $0x88] sm:$0xff] %v234_v17  ;;  %v238_v19 = vld [vmem:[%s2751_s6 + $0x118] sm:$0xff]  ;;  %v240_v20 = vld [vmem:[%s2751_s6 + $0x140] sm:$0xff] }
  0x19   : > { %237 = vst [vmem:[%s2756_s7 + $0x90] sm:$0xff] %v236_v18  ;;  %239 = vst [vmem:[%s2756_s7 + $0x98] sm:$0xff] %v238_v19  ;;  %v242_v21 = vld [vmem:[%s2751_s6 + $0x148] sm:$0xff]  ;;  %v244_v22 = vld [vmem:[%s2751_s6 + $0x150] sm:$0xff] }
  0x1a   : > { %241 = vst [vmem:[%s2756_s7 + $0xa0] sm:$0xff] %v240_v20  ;;  %v246_v23 = vld [vmem:[%s2751_s6 + $0x158] sm:$0xff]  ;;  %243 = vst [vmem:[%s2756_s7 + $0xa8] sm:$0xff] %v242_v21  ;;  %v248_v24 = vld [vmem:[%s2751_s6 + $0x180] sm:$0xff] }
  0x1b   : > { %245 = vst [vmem:[%s2756_s7 + $0xb0] sm:$0xff] %v244_v22  ;;  %247 = vst [vmem:[%s2756_s7 + $0xb8] sm:$0xff] %v246_v23  ;;  %v250_v25 = vld [vmem:[%s2751_s6 + $0x188] sm:$0xff]  ;;  %v252_v26 = vld [vmem:[%s2751_s6 + $0x190] sm:$0xff] }
  0x1c   : > { %249 = vst [vmem:[%s2756_s7 + $0xc0] sm:$0xff] %v248_v24  ;;  %251 = vst [vmem:[%s2756_s7 + $0xc8] sm:$0xff] %v250_v25  ;;  %v254_v27 = vld [vmem:[%s2751_s6 + $0x198] sm:$0xff]  ;;  %v256_v28 = vld [vmem:[%s2751_s6 + $0x1c0] sm:$0xff] }
  0x1d   : > { %253 = vst [vmem:[%s2756_s7 + $0xd0] sm:$0xff] %v252_v26  ;;  %v258_v29 = vld [vmem:[%s2751_s6 + $0x1c8] sm:$0xff]  ;;  %255 = vst [vmem:[%s2756_s7 + $0xd8] sm:$0xff] %v254_v27  ;;  %v260_v30 = vld [vmem:[%s2751_s6 + $0x1d0] sm:$0xff] }
  0x1e   : > { %257 = vst [vmem:[%s2756_s7 + $0xe0] sm:$0xff] %v256_v28  ;;  %259 = vst [vmem:[%s2756_s7 + $0xe8] sm:$0xff] %v258_v29  ;;  %v262_v31 = vld [vmem:[%s2751_s6 + $0x1d8] sm:$0xff]  ;;  %v264_v32 = vld [vmem:[%s2751_s6 + $0x200] sm:$0xff] }
  0x1f   : > { %261 = vst [vmem:[%s2756_s7 + $0xf0] sm:$0xff] %v260_v30  ;;  %263 = vst [vmem:[%s2756_s7 + $0xf8] sm:$0xff] %v262_v31  ;;  %v266_v33 = vld [vmem:[%s2751_s6 + $0x208] sm:$0xff]  ;;  %v268_v34 = vld [vmem:[%s2751_s6 + $0x210] sm:$0xff] }
  0x20   : > { %265 = vst [vmem:[%s2756_s7 + $0x100] sm:$0xff] %v264_v32  ;;  %v270_v35 = vld [vmem:[%s2751_s6 + $0x218] sm:$0xff]  ;;  %267 = vst [vmem:[%s2756_s7 + $0x108] sm:$0xff] %v266_v33  ;;  %v272_v36 = vld [vmem:[%s2751_s6 + $0x240] sm:$0xff] }
  0x21   : > { %269 = vst [vmem:[%s2756_s7 + $0x110] sm:$0xff] %v268_v34  ;;  %271 = vst [vmem:[%s2756_s7 + $0x118] sm:$0xff] %v270_v35  ;;  %v274_v37 = vld [vmem:[%s2751_s6 + $0x248] sm:$0xff]  ;;  %v276_v38 = vld [vmem:[%s2751_s6 + $0x250] sm:$0xff] }
  0x22   : > { %273 = vst [vmem:[%s2756_s7 + $0x120] sm:$0xff] %v272_v36  ;;  %275 = vst [vmem:[%s2756_s7 + $0x128] sm:$0xff] %v274_v37  ;;  %v278_v39 = vld [vmem:[%s2751_s6 + $0x258] sm:$0xff]  ;;  %v280_v40 = vld [vmem:[%s2751_s6 + $0x280] sm:$0xff] }
  0x23   : > { %277 = vst [vmem:[%s2756_s7 + $0x130] sm:$0xff] %v276_v38  ;;  %v282_v41 = vld [vmem:[%s2751_s6 + $0x288] sm:$0xff]  ;;  %279 = vst [vmem:[%s2756_s7 + $0x138] sm:$0xff] %v278_v39  ;;  %v284_v42 = vld [vmem:[%s2751_s6 + $0x290] sm:$0xff] }
  0x24   : > { %281 = vst [vmem:[%s2756_s7 + $0x140] sm:$0xff] %v280_v40  ;;  %283 = vst [vmem:[%s2756_s7 + $0x148] sm:$0xff] %v282_v41  ;;  %v286_v43 = vld [vmem:[%s2751_s6 + $0x298] sm:$0xff]  ;;  %v288_v44 = vld [vmem:[%s2751_s6 + $0x2c0] sm:$0xff] }
  0x25   : > { %285 = vst [vmem:[%s2756_s7 + $0x150] sm:$0xff] %v284_v42  ;;  %287 = vst [vmem:[%s2756_s7 + $0x158] sm:$0xff] %v286_v43  ;;  %v290_v45 = vld [vmem:[%s2751_s6 + $0x2c8] sm:$0xff]  ;;  %v292_v46 = vld [vmem:[%s2751_s6 + $0x2d0] sm:$0xff] }
  0x26   : > { %289 = vst [vmem:[%s2756_s7 + $0x160] sm:$0xff] %v288_v44  ;;  %v294_v47 = vld [vmem:[%s2751_s6 + $0x2d8] sm:$0xff]  ;;  %291 = vst [vmem:[%s2756_s7 + $0x168] sm:$0xff] %v290_v45  ;;  %v296_v48 = vld [vmem:[%s2751_s6 + $0x300] sm:$0xff] }
  0x27   : > { %293 = vst [vmem:[%s2756_s7 + $0x170] sm:$0xff] %v292_v46  ;;  %295 = vst [vmem:[%s2756_s7 + $0x178] sm:$0xff] %v294_v47  ;;  %v298_v49 = vld [vmem:[%s2751_s6 + $0x308] sm:$0xff]  ;;  %v300_v50 = vld [vmem:[%s2751_s6 + $0x310] sm:$0xff] }
  0x28   : > { %297 = vst [vmem:[%s2756_s7 + $0x180] sm:$0xff] %v296_v48  ;;  %299 = vst [vmem:[%s2756_s7 + $0x188] sm:$0xff] %v298_v49  ;;  %v302_v51 = vld [vmem:[%s2751_s6 + $0x318] sm:$0xff]  ;;  %v304_v52 = vld [vmem:[%s2751_s6 + $0x340] sm:$0xff] }
  0x29   : > { %301 = vst [vmem:[%s2756_s7 + $0x190] sm:$0xff] %v300_v50  ;;  %v306_v53 = vld [vmem:[%s2751_s6 + $0x348] sm:$0xff]  ;;  %303 = vst [vmem:[%s2756_s7 + $0x198] sm:$0xff] %v302_v51  ;;  %v308_v54 = vld [vmem:[%s2751_s6 + $0x350] sm:$0xff] }
  0x2a   : > { %305 = vst [vmem:[%s2756_s7 + $0x1a0] sm:$0xff] %v304_v52  ;;  %307 = vst [vmem:[%s2756_s7 + $0x1a8] sm:$0xff] %v306_v53  ;;  %v310_v55 = vld [vmem:[%s2751_s6 + $0x358] sm:$0xff]  ;;  %v312_v56 = vld [vmem:[%s2751_s6 + $0x380] sm:$0xff] }
  0x2b   : > { %309 = vst [vmem:[%s2756_s7 + $0x1b0] sm:$0xff] %v308_v54  ;;  %311 = vst [vmem:[%s2756_s7 + $0x1b8] sm:$0xff] %v310_v55  ;;  %v314_v57 = vld [vmem:[%s2751_s6 + $0x388] sm:$0xff]  ;;  %v316_v58 = vld [vmem:[%s2751_s6 + $0x390] sm:$0xff] }
  0x2c   : > { %313 = vst [vmem:[%s2756_s7 + $0x1c0] sm:$0xff] %v312_v56  ;;  %v318_v59 = vld [vmem:[%s2751_s6 + $0x398] sm:$0xff]  ;;  %315 = vst [vmem:[%s2756_s7 + $0x1c8] sm:$0xff] %v314_v57  ;;  %v320_v60 = vld [vmem:[%s2751_s6 + $0x3c0] sm:$0xff] }
  0x2d   : > { %317 = vst [vmem:[%s2756_s7 + $0x1d0] sm:$0xff] %v316_v58  ;;  %319 = vst [vmem:[%s2756_s7 + $0x1d8] sm:$0xff] %v318_v59  ;;  %v322_v61 = vld [vmem:[%s2751_s6 + $0x3c8] sm:$0xff]  ;;  %v324_v62 = vld [vmem:[%s2751_s6 + $0x3d0] sm:$0xff] }
  0x2e   : > { %321 = vst [vmem:[%s2756_s7 + $0x1e0] sm:$0xff] %v320_v60  ;;  %323 = vst [vmem:[%s2756_s7 + $0x1e8] sm:$0xff] %v322_v61  ;;  %v326_v63 = vld [vmem:[%s2751_s6 + $0x3d8] sm:$0xff] }
  0x2f   : > { %325 = vst [vmem:[%s2756_s7 + $0x1f0] sm:$0xff] %v324_v62  ;;  %327 = vst [vmem:[%s2756_s7 + $0x1f8] sm:$0xff] %v326_v63 }
  0x30 PF: > { %p2263_p5 = scmp.ge.s32.totalorder %s2679_s20, 1  ;;  %p350_p6 = scmp.lt.s32.totalorder %s2679_s20, 3 }
  0x32   : > { %p351_p7 = pnand %p2263_p5, %p350_p6 }
  0x33   : > { %s357_s8 = sand.u32 (!%p351_p7), 1, %s2671_s18   ;;  %s2265_s9 = sshll.u32 (!%p351_p7), %s2731_s21, 3 }
  0x34   : > { %354 = sbr.rel (%p351_p7) target bundleno = 793 (0x319), region = 59  ;;  %s2264_s10 = sshll.u32 (!%p351_p7), %s357_s8, 9 }
  0x35   : > { %p391_p8 = scmp.lt.s32.totalorder (!%p351_p7), %s2265_s9, 15  ;;  %s2267_s11 = sshll.u32 (!%p351_p7), %s2731_s21, 7 }
  0x36   : > { %p397_p9 = scmp.lt.s32.totalorder (!%p351_p7), %s2267_s11, 255  ;;  %s2898_s18 = scalar_lea.vmem (!%p351_p7), [#allocation2], %s2264_s10 }
  0x37   : > { %p2269_p10 = scmp.ne.s32.totalorder (!%p351_p7), %s2731_s21, 0 }
  0x39   : > { %s3304_s9 = smov (!%p391_p8, %s2265_s9), 15  ;;  %s3306_s11 = smov (!%p397_p9, %s2267_s11), 255 }
  0x3a   : > { %s2266_s12 = sshll.u32 %s3304_s9, 2  ;;  %s2268_s16 = sshll.u32 %s3306_s11, 2 }
  0x3b   : > { %s2891_s15 = scalar_lea.vmem %s3296_s2, %s2266_s12  ;;  %s2896_s23 = scalar_lea.vmem %s3297_s3, %s2268_s16 }
  0x3c   : > { %406 = sbr.rel (%p2269_p10) target bundleno = 67 (0x43), region = 67 }
  0x41   : > { %v2681_v0 = vmov 0.0  }
  0x42   : > { %407 = vst [vmem:[#allocation3] sm:$0xff] %v2681_v0 }
  0x43 PF: > { %v465_v1 = vld [vmem:[%s2898_s18 + $0x1c0] sm:$0xff]  ;;  %v466_v3 = vld [vmem:[%s2898_s18 + $0x1c8] sm:$0xff]  ;;  %v2682_v9 = vmov 0   ;;  %v467_v61 = vld [vmem:[%s2898_s18 + $0x1d0] sm:$0xff]  ;;  %p2400_p11 = scmp.ne.s32.totalorder %s2731_s21, 1 }
  0x44   : > { %v469_v2 = vld [vmem:[%s2898_s18 + $0x1e0] sm:$0xff]  ;;  %v470_v5 = vld [vmem:[%s2898_s18 + $0x1e8] sm:$0xff]  ;;  %867 = vmatprep.mubr.bf16.mxu0 %v2682_v9  ;;  %908 = vmatprep.mubr.bf16.mxu1 %v2682_v9  ;;  %v471_v62 = vld [vmem:[%s2898_s18 + $0x1f0] sm:$0xff] }
  0x45   : > { %v2327_v4 = vcombine.high %v465_v1, %v469_v2  ;;  %v2326_v6 = vcombine.low %v465_v1, %v469_v2  ;;  %v457_v7 = vld [vmem:[%s2898_s18 + $0x180] sm:$0xff]  ;;  %v2329_v10 = vcombine.high %v466_v3, %v470_v5  ;;  %v2328_v11 = vcombine.low %v466_v3, %v470_v5  ;;  %v458_v13 = vld [vmem:[%s2898_s18 + $0x188] sm:$0xff]  ;;  %v468_v1 = vld [vmem:[%s2898_s18 + $0x1d8] sm:$0xff] }
  0x46   : > { %v461_v8 = vld [vmem:[%s2898_s18 + $0x1a0] sm:$0xff]  ;;  %v462_v14 = vld [vmem:[%s2898_s18 + $0x1a8] sm:$0xff]  ;;  %v472_v2 = vld [vmem:[%s2898_s18 + $0x1f8] sm:$0xff] }
  0x47   : > { %v2319_v12 = vcombine.high %v457_v7, %v461_v8  ;;  %v449_v15 = vld [vmem:[%s2898_s18 + $0x140] sm:$0xff]  ;;  %835 = vmatprep.subr.bf16.mxu0 %v2327_v4  ;;  %v2321_v16 = vcombine.high %v458_v13, %v462_v14  ;;  %v450_v18 = vld [vmem:[%s2898_s18 + $0x148] sm:$0xff]  ;;  %876 = vmatprep.subr.bf16.mxu1 %v2329_v10  ;;  %v2318_v20 = vcombine.low %v457_v7, %v461_v8  ;;  %v459_v5 = vld [vmem:[%s2898_s18 + $0x190] sm:$0xff] }
  0x48   : > { %v453_v17 = vld [vmem:[%s2898_s18 + $0x160] sm:$0xff]  ;;  %v454_v19 = vld [vmem:[%s2898_s18 + $0x168] sm:$0xff]  ;;  %836 = vmatpush1.bf16.msra.mxu0 %v2326_v6  ;;  %877 = vmatpush1.bf16.msra.mxu1 %v2328_v11  ;;  %v2320_v21 = vcombine.low %v458_v13, %v462_v14  ;;  %v463_v6 = vld [vmem:[%s2898_s18 + $0x1b0] sm:$0xff]  ;;  %v2331_v8 = vcombine.high %v467_v61, %v471_v62  ;;  %v2333_v13 = vcombine.high %v468_v1, %v472_v2 }
  0x49   : > { %837 = vmatprep.subr.bf16.mxu0 %v2319_v12  ;;  %v2311_v22 = vcombine.high %v449_v15, %v453_v17  ;;  %878 = vmatprep.subr.bf16.mxu1 %v2321_v16  ;;  %v2313_v23 = vcombine.high %v450_v18, %v454_v19  ;;  %v441_v24 = vld [vmem:[%s2898_s18 + $0x100] sm:$0xff]  ;;  %v442_v26 = vld [vmem:[%s2898_s18 + $0x108] sm:$0xff]  ;;  %v2310_v28 = vcombine.low %v449_v15, %v453_v17  ;;  %v460_v10 = vld [vmem:[%s2898_s18 + $0x198] sm:$0xff] }
  0x4a   : > { %v445_v25 = vld [vmem:[%s2898_s18 + $0x120] sm:$0xff]  ;;  %v446_v27 = vld [vmem:[%s2898_s18 + $0x128] sm:$0xff]  ;;  %v2312_v29 = vcombine.low %v450_v18, %v454_v19  ;;  %v464_v11 = vld [vmem:[%s2898_s18 + $0x1b8] sm:$0xff]  ;;  %v2330_v14 = vcombine.low %v467_v61, %v471_v62  ;;  %v2332_v17 = vcombine.low %v468_v1, %v472_v2  ;;  %v2323_v18 = vcombine.high %v459_v5, %v463_v6 }
  0x4b   : > { %v2303_v30 = vcombine.high %v441_v24, %v445_v25  ;;  %v2305_v31 = vcombine.high %v442_v26, %v446_v27  ;;  %v433_v32 = vld [vmem:[%s2898_s18 + $0xc0] sm:$0xff]  ;;  %v434_v34 = vld [vmem:[%s2898_s18 + $0xc8] sm:$0xff]  ;;  %v2302_v36 = vcombine.low %v441_v24, %v445_v25  ;;  %v2304_v37 = vcombine.low %v442_v26, %v446_v27  ;;  %v451_v15 = vld [vmem:[%s2898_s18 + $0x150] sm:$0xff] }
  0x4c   : > { %838 = vmatpush1.bf16.msra.mxu0 %v2318_v20  ;;  %879 = vmatpush1.bf16.msra.mxu1 %v2320_v21  ;;  %v437_v33 = vld [vmem:[%s2898_s18 + $0xe0] sm:$0xff]  ;;  %v438_v35 = vld [vmem:[%s2898_s18 + $0xe8] sm:$0xff]  ;;  %v455_v16 = vld [vmem:[%s2898_s18 + $0x170] sm:$0xff]  ;;  %v2325_v21 = vcombine.high %v460_v10, %v464_v11  ;;  %v2324_v25 = vcombine.low %v460_v10, %v464_v11 }
  0x4d   : > { %839 = vmatprep.subr.bf16.mxu0 %v2311_v22  ;;  %880 = vmatprep.subr.bf16.mxu1 %v2313_v23  ;;  %v2295_v38 = vcombine.high %v433_v32, %v437_v33  ;;  %v2297_v39 = vcombine.high %v434_v34, %v438_v35  ;;  %v425_v40 = vld [vmem:[%s2898_s18 + $0x80] sm:$0xff]  ;;  %v426_v42 = vld [vmem:[%s2898_s18 + $0x88] sm:$0xff]  ;;  %v2294_v44 = vcombine.low %v433_v32, %v437_v33  ;;  %v452_v19 = vld [vmem:[%s2898_s18 + $0x158] sm:$0xff] }
  0x4e   : > { %v429_v41 = vld [vmem:[%s2898_s18 + $0xa0] sm:$0xff]  ;;  %v430_v43 = vld [vmem:[%s2898_s18 + $0xa8] sm:$0xff]  ;;  %v2296_v45 = vcombine.low %v434_v34, %v438_v35  ;;  %v456_v20 = vld [vmem:[%s2898_s18 + $0x178] sm:$0xff]  ;;  %v2322_v22 = vcombine.low %v459_v5, %v463_v6  ;;  %v2315_v26 = vcombine.high %v451_v15, %v455_v16 }
  0x4f   : > { %v2287_v46 = vcombine.high %v425_v40, %v429_v41  ;;  %v2289_v47 = vcombine.high %v426_v42, %v430_v43  ;;  %v417_v48 = vld [vmem:[%s2898_s18 + $0x40] sm:$0xff]  ;;  %v418_v50 = vld [vmem:[%s2898_s18 + $0x48] sm:$0xff]  ;;  %v2286_v52 = vcombine.low %v425_v40, %v429_v41  ;;  %v2288_v54 = vcombine.low %v426_v42, %v430_v43  ;;  %v443_v23 = vld [vmem:[%s2898_s18 + $0x110] sm:$0xff] }
  0x50   : > { %840 = vmatpush1.bf16.msra.mxu0 %v2310_v28  ;;  %881 = vmatpush1.bf16.msra.mxu1 %v2312_v29  ;;  %v421_v49 = vld [vmem:[%s2898_s18 + $0x60] sm:$0xff]  ;;  %v422_v51 = vld [vmem:[%s2898_s18 + $0x68] sm:$0xff]  ;;  %v447_v24 = vld [vmem:[%s2898_s18 + $0x130] sm:$0xff]  ;;  %v2317_v29 = vcombine.high %v452_v19, %v456_v20  ;;  %v2316_v33 = vcombine.low %v452_v19, %v456_v20 }
  0x51   : > { %841 = vmatprep.subr.bf16.mxu0 %v2303_v30  ;;  %882 = vmatprep.subr.bf16.mxu1 %v2305_v31  ;;  %v409_v53 = vld [vmem:[%s2898_s18] sm:$0xff]  ;;  %v2279_v55 = vcombine.high %v417_v48, %v421_v49  ;;  %v410_v57 = vld [vmem:[%s2898_s18 + $0x8] sm:$0xff]  ;;  %v2281_v59 = vcombine.high %v418_v50, %v422_v51  ;;  %v2278_v60 = vcombine.low %v417_v48, %v421_v49  ;;  %v444_v27 = vld [vmem:[%s2898_s18 + $0x118] sm:$0xff] }
  0x52   : > { %v413_v56 = vld [vmem:[%s2898_s18 + $0x20] sm:$0xff]  ;;  %v414_v58 = vld [vmem:[%s2898_s18 + $0x28] sm:$0xff]  ;;  %v2280_v63 = vcombine.low %v418_v50, %v422_v51  ;;  %v448_v28 = vld [vmem:[%s2898_s18 + $0x138] sm:$0xff]  ;;  %v2314_v30 = vcombine.low %v451_v15, %v455_v16  ;;  %v2307_v34 = vcombine.high %v443_v23, %v447_v24 }
  0x53   : > { %v2271_v0 = vcombine.high %v409_v53, %v413_v56  ;;  %v2273_v3 = vcombine.high %v410_v57, %v414_v58  ;;  %v2270_v4 = vcombine.low %v409_v53, %v413_v56  ;;  %v2272_v7 = vcombine.low %v410_v57, %v414_v58  ;;  %v2946_v12 = vld [vmem:[%s3294_s0] sm:$0xf]  ;;  %v435_v31 = vld [vmem:[%s2898_s18 + $0xd0] sm:$0xff]  ;;  %v436_v35 = vld [vmem:[%s2898_s18 + $0xd8] sm:$0xff] }
  0x54   : > { %842 = vmatpush1.bf16.msra.mxu0 %v2302_v36  ;;  %883 = vmatpush1.bf16.msra.mxu1 %v2304_v37  ;;  %v439_v32 = vld [vmem:[%s2898_s18 + $0xf0] sm:$0xff]  ;;  %v440_v36 = vld [vmem:[%s2898_s18 + $0xf8] sm:$0xff]  ;;  %v2309_v37 = vcombine.high %v444_v27, %v448_v28  ;;  %v2308_v40 = vcombine.low %v444_v27, %v448_v28  ;;  %v2540_v27 = vld [vmem:[%s2896_s23 + $0xa8] sm:$0xff]  }
  0x55   : > { %843 = vmatprep.subr.bf16.mxu0 %v2295_v38  ;;  %884 = vmatprep.subr.bf16.mxu1 %v2297_v39  ;;  %v2306_v38 = vcombine.low %v443_v23, %v447_v24  ;;  %v431_v39 = vld [vmem:[%s2898_s18 + $0xb0] sm:$0xff]  ;;  %v2299_v41 = vcombine.high %v435_v31, %v439_v32  ;;  %v428_v42 = vld [vmem:[%s2898_s18 + $0x98] sm:$0xff]  ;;  %v2300_v48 = vcombine.low %v436_v35, %v440_v36  ;;  %v2538_v23 = vld [vmem:[%s2896_s23 + $0xe8] sm:$0xff]  }
  0x56   : > { %v432_v43 = vld [vmem:[%s2898_s18 + $0xb8] sm:$0xff]  ;;  %v2534_v15 = vld [vmem:[%s2896_s23 + $0xf0] sm:$0xff]  }
  0x57   : > { %v420_v50 = vld [vmem:[%s2898_s18 + $0x58] sm:$0xff]  ;;  %v2292_v56 = vcombine.low %v428_v42, %v432_v43 }
  0x58   : > { %844 = vmatpush1.bf16.msra.mxu0 %v2294_v44  ;;  %885 = vmatpush1.bf16.msra.mxu1 %v2296_v45  ;;  %v2301_v44 = vcombine.high %v436_v35, %v440_v36  ;;  %v2298_v45 = vcombine.low %v435_v31, %v439_v32  ;;  %v424_v51 = vld [vmem:[%s2898_s18 + $0x78] sm:$0xff]  ;;  %v2541_v35 = vld [vmem:[%s2896_s23 + $0x60] sm:$0xff]  }
  0x59   : > { %845 = vmatprep.subr.bf16.mxu0 %v2287_v46  ;;  %886 = vmatprep.subr.bf16.mxu1 %v2289_v47  ;;  %v419_v46 = vld [vmem:[%s2898_s18 + $0x50] sm:$0xff]  ;;  %v412_v58 = vld [vmem:[%s2898_s18 + $0x18] sm:$0xff]  ;;  %v2284_v62 = vcombine.low %v420_v50, %v424_v51  ;;  %v2542_v36 = vld [vmem:[%s2896_s23 + $0xe0] sm:$0xff]  }
  0x5a   : > { %v423_v47 = vld [vmem:[%s2898_s18 + $0x70] sm:$0xff]  ;;  %v2529_v5 = vld [vmem:[%s2896_s23 + $0x78] sm:$0xff]  }
  0x5b   : > { %v2283_v57 = vcombine.high %v419_v46, %v423_v47  ;;  %v2282_v61 = vcombine.low %v419_v46, %v423_v47  ;;  %v2530_v6 = vld [vmem:[%s2896_s23 + $0xf8] sm:$0xff]  }
  0x5c   : > { %846 = vmatpush1.bf16.msra.mxu0 %v2286_v52  ;;  %887 = vmatpush1.bf16.msra.mxu1 %v2288_v54  ;;  %v2293_v52 = vcombine.high %v428_v42, %v432_v43  ;;  %v411_v54 = vld [vmem:[%s2898_s18 + $0x10] sm:$0xff] }
  0x5d   : > { %847 = vmatprep.subr.bf16.mxu0 %v2279_v55  ;;  %888 = vmatprep.subr.bf16.mxu1 %v2281_v59  ;;  %v415_v55 = vld [vmem:[%s2898_s18 + $0x30] sm:$0xff]  ;;  %v416_v59 = vld [vmem:[%s2898_s18 + $0x38] sm:$0xff] }
  0x5e   : > { %v2274_v1 = vcombine.low %v411_v54, %v415_v55  ;;  %v2276_v2 = vcombine.low %v412_v58, %v416_v59  ;;  %v2988_v11 = vld [vmem:[%s2891_s15] ss:$4 sm:$0xff] }
  0x60   : > { %848 = vmatpush1.bf16.msra.mxu0 %v2278_v60  ;;  %889 = vmatpush1.bf16.msra.mxu1 %v2280_v63  ;;  %v2285_v60 = vcombine.high %v420_v50, %v424_v51  ;;  %v2275_v63 = vcombine.high %v411_v54, %v415_v55  ;;  %v2545_v50 = vld [vmem:[%s2896_s23 + $0x58] sm:$0xff]  }
  0x61   : > { %849 = vmatprep.subr.bf16.mxu0 %v2271_v0  ;;  %890 = vmatprep.subr.bf16.mxu1 %v2273_v3  ;;  %v2277_v0 = vcombine.high %v412_v58, %v416_v59  ;;  %v475_v3 = vlaneseq  ;;  %v2546_v51 = vld [vmem:[%s2896_s23 + $0xd8] sm:$0xff]  }
  0x62   : > { %v2547_v54 = vld [vmem:[%s2896_s23 + $0x18] sm:$0xff]  }
  0x63   : > { %v2548_v55 = vld [vmem:[%s2896_s23 + $0x98] sm:$0xff]  }
  0x64   : > { %850 = vmatpush1.bf16.msra.mxu0 %v2270_v4  ;;  %891 = vmatpush1.bf16.msra.mxu1 %v2272_v7  ;;  %v2978_v4 = vshrl.u32 %v475_v3, 7  ;;  %v2531_v7 = vld [vmem:[%s2896_s23 + $0x38] sm:$0xff]   ;;  %v2552_v3 = vld [vmem:[%s2896_s23 + $0x90] sm:$0xff]  }
  0x65   : > { %917 = vmatprep.subr.bf16.mxu0 %v2331_v8  ;;  %958 = vmatprep.subr.bf16.mxu1 %v2333_v13  ;;  %v2532_v8 = vld [vmem:[%s2896_s23 + $0xb8] sm:$0xff]  }
  0x66   : > { %v2985_v10 = vsub.s32 0, %v2978_v4  ;;  %v2991_v13 = vsub.s32 2, %v2978_v4  ;;  %v2999_v16 = vsub.s32 3, %v2978_v4 }
  0x67   : > { %868 = vmatmul.mubr.bf16.vlgmr.msra.gmra.mxu0 %v2946_v12  ;;  %909 = vmatmul.mubr.bf16.vlgmr.msra.gmra.mxu1 %v2946_v12 }
  0x68   : > { %918 = vmatpush1.bf16.msra.mxu0 %v2330_v14  ;;  %959 = vmatpush1.bf16.msra.mxu1 %v2332_v17  ;;  %v2533_v14 = vld [vmem:[%s2896_s23 + $0x70] sm:$0xff]   ;;  %v478_v19 = vrot.slane %v2988_v11, %v2985_v10  ;;  %v486_v20 = vrot.slane %v2988_v11, %v2991_v13 }
  0x69   : > { %919 = vmatprep.subr.bf16.mxu0 %v2323_v18  ;;  %960 = vmatprep.subr.bf16.mxu1 %v2325_v21  ;;  %v2535_v17 = vld [vmem:[%s2896_s23 + $0x30] sm:$0xff]  }
  0x6a   : > { %949 = vmatprep.mubr.bf16.mxu0 %v2682_v9  ;;  %990 = vmatprep.mubr.bf16.mxu1 %v2682_v9  ;;  %v427_v9 = vld [vmem:[%s2898_s18 + $0x90] sm:$0xff] }
  0x6b   : > { %v2291_v49 = vcombine.high %v427_v9, %v431_v39  ;;  %v2290_v53 = vcombine.low %v427_v9, %v431_v39  ;;  %v2536_v18 = vld [vmem:[%s2896_s23 + $0xb0] sm:$0xff]   ;;  %v2543_v39 = vld [vmem:[%s2896_s23 + $0x20] sm:$0xff]  }
  0x6c   : > { %920 = vmatpush1.bf16.msra.mxu0 %v2322_v22  ;;  %961 = vmatpush1.bf16.msra.mxu1 %v2324_v25  ;;  %v2537_v22 = vld [vmem:[%s2896_s23 + $0x68] sm:$0xff]   ;;  %v490_v25 = vrot.slane %v2988_v11, %v2999_v16 }
  0x6d   : > { %921 = vmatprep.subr.bf16.mxu0 %v2315_v26  ;;  %962 = vmatprep.subr.bf16.mxu1 %v2317_v29  ;;  %v2539_v26 = vld [vmem:[%s2896_s23 + $0x28] sm:$0xff]  }
  0x70   : > { %922 = vmatpush1.bf16.msra.mxu0 %v2314_v30  ;;  %963 = vmatpush1.bf16.msra.mxu1 %v2316_v33 }
  0x71   : > { %923 = vmatprep.subr.bf16.mxu0 %v2307_v34  ;;  %964 = vmatprep.subr.bf16.mxu1 %v2309_v37 }
  0x74   : > { %924 = vmatpush1.bf16.msra.mxu0 %v2306_v38  ;;  %965 = vmatpush1.bf16.msra.mxu1 %v2308_v40  ;;  %v2544_v40 = vld [vmem:[%s2896_s23 + $0xa0] sm:$0xff]  }
  0x75   : > { %925 = vmatprep.subr.bf16.mxu0 %v2299_v41  ;;  %966 = vmatprep.subr.bf16.mxu1 %v2301_v44 }
  0x78   : > { %926 = vmatpush1.bf16.msra.mxu0 %v2298_v45  ;;  %967 = vmatpush1.bf16.msra.mxu1 %v2300_v48 }
  0x79   : > { %927 = vmatprep.subr.bf16.mxu0 %v2291_v49  ;;  %968 = vmatprep.subr.bf16.mxu1 %v2293_v52 }
  0x7c   : > { %928 = vmatpush1.bf16.msra.mxu0 %v2290_v53  ;;  %969 = vmatpush1.bf16.msra.mxu1 %v2292_v56 }
  0x7d   : > { %929 = vmatprep.subr.bf16.mxu0 %v2283_v57  ;;  %970 = vmatprep.subr.bf16.mxu1 %v2285_v60 }
  0x80   : > { %930 = vmatpush1.bf16.msra.mxu0 %v2282_v61  ;;  %971 = vmatpush1.bf16.msra.mxu1 %v2284_v62  ;;  %v2549_v62 = vld [vmem:[%s2896_s23 + $0x50] sm:$0xff]  }
  0x81   : > { %931 = vmatprep.subr.bf16.mxu0 %v2275_v63  ;;  %972 = vmatprep.subr.bf16.mxu1 %v2277_v0  ;;  %v2550_v63 = vld [vmem:[%s2896_s23 + $0xd0] sm:$0xff]  }
  0x84   : > { %932 = vmatpush1.bf16.msra.mxu0 %v2274_v1  ;;  %973 = vmatpush1.bf16.msra.mxu1 %v2276_v2  ;;  %v2551_v2 = vld [vmem:[%s2896_s23 + $0x10] sm:$0xff]  }
  0x85   : > { %2407 = vmatprep.subr.bf16.mxu0 %v2529_v5  ;;  %2429 = vmatprep.subr.bf16.mxu1 %v2530_v6  ;;  %v2553_v6 = vld [vmem:[%s2896_s23 + $0x48] sm:$0xff]  }
  0x87   : > { %950 = vmatmul.mubr.bf16.vlgmr.msra.gmra.mxu0 %v2946_v12  ;;  %991 = vmatmul.mubr.bf16.vlgmr.msra.gmra.mxu1 %v2946_v12  ;;  %v2994_v12 = vsub.s32 1, %v2978_v4 }
  0x88   : > { %2408 = vmatpush3.bf16.msra.mxu0 %v2531_v7  ;;  %2430 = vmatpush3.bf16.msra.mxu1 %v2532_v8  ;;  %v2554_v7 = vld [vmem:[%s2896_s23 + $0xc8] sm:$0xff]  }
  0x89   : > { %2409 = vmatprep.subr.bf16.mxu0 %v2533_v14  ;;  %2431 = vmatprep.subr.bf16.mxu1 %v2534_v15  ;;  %v482_v21 = vrot.slane %v2988_v11, %v2994_v12  ;;  %v2555_v14 = vld [vmem:[%s2896_s23 + $0x8] sm:$0xff]  }
  0x8a   : > { %v2556_v15 = vld [vmem:[%s2896_s23 + $0x88] sm:$0xff]  }
  0x8c   : > { %2410 = vmatpush3.bf16.msra.mxu0 %v2535_v17  ;;  %2432 = vmatpush3.bf16.msra.mxu1 %v2536_v18  ;;  %v2557_v17 = vld [vmem:[%s2896_s23 + $0x40] sm:$0xff]  }
  0x8d   : > { %2411 = vmatprep.subr.bf16.mxu0 %v2537_v22  ;;  %2433 = vmatprep.subr.bf16.mxu1 %v2538_v23  ;;  %v2558_v18 = vld [vmem:[%s2896_s23 + $0xc0] sm:$0xff]   ;;  %v2561_v22 = vld [vmem:[%s2896_s23 + $0x178] sm:$0xff]  }
  0x8e   : > { %v2562_v23 = vld [vmem:[%s2896_s23 + $0x1f8] sm:$0xff]  }
  0x90   : > { %2412 = vmatpush3.bf16.msra.mxu0 %v2539_v26  ;;  %2434 = vmatpush3.bf16.msra.mxu1 %v2540_v27 }
  0x91   : > { %2413 = vmatprep.subr.bf16.mxu0 %v2541_v35  ;;  %2435 = vmatprep.subr.bf16.mxu1 %v2542_v36 }
  0x94   : > { %2414 = vmatpush3.bf16.msra.mxu0 %v2543_v39  ;;  %2436 = vmatpush3.bf16.msra.mxu1 %v2544_v40  ;;  %v3075_v40 = vsub.s32 5, %v2978_v4 }
  0x95   : > { %2415 = vmatprep.subr.bf16.mxu0 %v2545_v50  ;;  %2437 = vmatprep.subr.bf16.mxu1 %v2546_v51 }
  0x96   : > { %v498_v50 = vrot.slane %v2988_v11, %v3075_v40 }
  0x98   : > { %2416 = vmatpush3.bf16.msra.mxu0 %v2547_v54  ;;  %2438 = vmatpush3.bf16.msra.mxu1 %v2548_v55 }
  0x99   : > { %2417 = vmatprep.subr.bf16.mxu0 %v2549_v62  ;;  %2439 = vmatprep.subr.bf16.mxu1 %v2550_v63 }
  0x9c   : > { %2418 = vmatpush3.bf16.msra.mxu0 %v2551_v2  ;;  %2440 = vmatpush3.bf16.msra.mxu1 %v2552_v3 }
  0x9d   : > { %2419 = vmatprep.subr.bf16.mxu0 %v2553_v6  ;;  %2441 = vmatprep.subr.bf16.mxu1 %v2554_v7 }
  0xa0   : > { %2420 = vmatpush3.bf16.msra.mxu0 %v2555_v14  ;;  %2442 = vmatpush3.bf16.msra.mxu1 %v2556_v15 }
  0xa1   : > { %2421 = vmatprep.subr.bf16.mxu0 %v2557_v17  ;;  %2443 = vmatprep.subr.bf16.mxu1 %v2558_v18 }
 0x127   : > { %v869_v24 = vpop.f32.mrf.mxu0  ;;  %v910_v29 = vpop.f32.mrf.mxu1 }
 0x128   : > { %v3015_v28 = vadd.f32 %v869_v24, %v478_v19  ;;  %v3017_v30 = vadd.f32 %v910_v29, %v486_v20  ;;  %v2559_v19 = vld [vmem:[%s2896_s23] sm:$0xff]  }
 0x129   : > { %v871_v31 = vpop.f32.mrf.mxu0  ;;  %v912_v34 = vpop.f32.mrf.mxu1  ;;  %v2560_v20 = vld [vmem:[%s2896_s23 + $0x80] sm:$0xff]   ;;  %2422 = vmatpush3.bf16.msra.mxu0 %v2559_v19 }
 0x12a   : > { %v1007_v32 = vmul.f32 %v3015_v28, %v3015_v28  ;;  %v3021_v33 = vadd.f32 %v871_v31, %v482_v21  ;;  %v1009_v37 = vmul.f32 %v3017_v30, %v3017_v30  ;;  %v3027_v38 = vadd.f32 %v912_v34, %v490_v25  ;;  %2444 = vmatpush3.bf16.msra.mxu1 %v2560_v20 }
 0x12b   : > { %v873_v9 = vpop.f32.mrf.mxu0  ;;  %v914_v43 = vpop.f32.mrf.mxu1  ;;  %v3060_v21 = vsub.s32 4, %v2978_v4  ;;  %v3065_v25 = vsub.s32 6, %v2978_v4  ;;  %v999_v27 = vmul.f32 0.5, %v3015_v28  ;;  %2451 = vmatprep.subr.bf16.mxu0 %v2561_v22  ;;  %2473 = vmatprep.subr.bf16.mxu1 %v2562_v23 }
 0x12c   : > { %v1015_v41 = vmul.f32 %v1007_v32, %v3015_v28  ;;  %v1008_v42 = vmul.f32 %v3021_v33, %v3021_v33  ;;  %v1017_v44 = vmul.f32 %v1009_v37, %v3017_v30  ;;  %v1010_v45 = vmul.f32 %v3027_v38, %v3027_v38 }
 0x12d   : > { %v874_v46 = vpop.f32.mrf.mxu0  ;;  %v915_v49 = vpop.f32.mrf.mxu1  ;;  %v1001_v32 = vmul.f32 0.5, %v3017_v30  ;;  %v494_v35 = vrot.slane %v2988_v11, %v3060_v21  ;;  %v1000_v9 = vmul.f32 0.5, %v3021_v33 }
 0x12e   : > { %v1023_v47 = vmul.f32 0.044715, %v1015_v41  ;;  %v1016_v48 = vmul.f32 %v1008_v42, %v3021_v33  ;;  %v1025_v52 = vmul.f32 0.044715, %v1017_v44  ;;  %v1018_v53 = vmul.f32 %v1010_v45, %v3027_v38 }
 0x12f   : > { %v1002_v41 = vmul.f32 0.5, %v3027_v38  ;;  %v3086_v45 = vsub.s32 7, %v2978_v4 }
 0x130   : > { %v1031_v56 = vadd.f32 %v1023_v47, %v3015_v28  ;;  %v1024_v57 = vmul.f32 0.044715, %v1016_v48  ;;  %v1033_v58 = vadd.f32 %v1025_v52, %v3017_v30  ;;  %v1026_v59 = vmul.f32 0.044715, %v1018_v53 }
 0x131   : > { %v502_v30 = vrot.slane %v2988_v11, %v3065_v25 }
 0x132   : > { %v1039_v60 = vmul.f32 0.7978846, %v1031_v56  ;;  %v1032_v61 = vadd.f32 %v1024_v57, %v3021_v33  ;;  %v1041_v0 = vmul.f32 0.7978846, %v1033_v58  ;;  %v1034_v1 = vadd.f32 %v1026_v59, %v3027_v38 }
 0x133   : > { %v506_v58 = vrot.slane %v2988_v11, %v3086_v45 }
 0x134   : > { %2593 = vtanh.f32 %v1039_v60  ;;  %v1040_v5 = vmul.f32 0.7978846, %v1032_v61  ;;  %v1042_v8 = vmul.f32 0.7978846, %v1034_v1 }
 0x135   : > { %2595 = vtanh.f32 %v1041_v0 }
 0x136   : > { %2597 = vtanh.f32 %v1040_v5 }
 0x137   : > { %2599 = vtanh.f32 %v1042_v8 }
 0x141   : > { %v2594_v24 = vpop.eup %2593 }
 0x142   : > { %v2596_v26 = vpop.eup %2595  ;;  %v1055_v29 = vadd.f32 1.0, %v2594_v24 }
 0x143   : > { %v2598_v31 = vpop.eup %2597  ;;  %v1057_v34 = vadd.f32 1.0, %v2596_v26 }
 0x144   : > { %v2600_v36 = vpop.eup %2599  ;;  %v3071_v37 = vmul.f32 %v1055_v29, %v999_v27  ;;  %v1056_v39 = vadd.f32 1.0, %v2598_v31 }
 0x145   : > { %v3077_v28 = vmul.f32 %v1057_v34, %v1001_v32  ;;  %v1058_v42 = vadd.f32 1.0, %v2600_v36 }
 0x146   : > { %v1075_v43 = vrot.slane %v3071_v37, 4  ;;  %v3083_v44 = vmul.f32 %v1056_v39, %v1000_v9 }
 0x147   : > { %v1087_v33 = vrot.slane %v3077_v28, 4  ;;  %v3089_v46 = vmul.f32 %v1058_v42, %v1002_v41  ;;  %v951_v47 = vpop.f32.mrf.mxu0  ;;  %v992_v38 = vpop.f32.mrf.mxu1 }
 0x148   : > { %v1081_v48 = vrot.slane %v3083_v44, 4  ;;  %v3092_v49 = vadd.f32 %v951_v47, %v494_v35  ;;  %v1076_v51 = vadd.f32 %v1075_v43, %v3071_v37  ;;  %v3098_v53 = vadd.f32 %v992_v38, %v502_v30 }
 0x149   : > { %v1093_v52 = vrot.slane %v3089_v46, 4  ;;  %v953_v54 = vpop.f32.mrf.mxu0  ;;  %v1088_v55 = vadd.f32 %v1087_v33, %v3077_v28  ;;  %v994_v59 = vpop.f32.mrf.mxu1 }
 0x14a   : > { %v1082_v56 = vadd.f32 %v1081_v48, %v3083_v44  ;;  %v1011_v57 = vmul.f32 %v3092_v49, %v3092_v49  ;;  %v1013_v61 = vmul.f32 %v3098_v53, %v3098_v53  ;;  %v3110_v1 = vadd.f32 %v953_v54, %v498_v50 }
 0x14b   : > { %v1094_v60 = vadd.f32 %v1093_v52, %v3089_v46  ;;  %v955_v62 = vpop.f32.mrf.mxu0  ;;  %v996_v2 = vpop.f32.mrf.mxu1  ;;  %v1077_v3 = vrot.slane %v1076_v51, 2  ;;  %v1089_v8 = vrot.slane %v1088_v55, 2  ;;  %v3113_v14 = vadd.f32 %v994_v59, %v506_v58 }
 0x14c   : > { %v1083_v63 = vrot.slane %v1082_v56, 2  ;;  %v1019_v0 = vmul.f32 %v1011_v57, %v3092_v49  ;;  %v1021_v6 = vmul.f32 %v1013_v61, %v3098_v53  ;;  %v1012_v19 = vmul.f32 %v3110_v1, %v3110_v1 }
 0x14d   : > { %v1095_v5 = vrot.slane %v1094_v60, 2  ;;  %v956_v7 = vpop.f32.mrf.mxu0  ;;  %v997_v15 = vpop.f32.mrf.mxu1  ;;  %v1078_v23 = vadd.f32 %v1077_v3, %v1076_v51  ;;  %v1090_v27 = vadd.f32 %v1089_v8, %v1088_v55  ;;  %v1014_v31 = vmul.f32 %v3113_v14, %v3113_v14 }
 0x14e   : > { %v1027_v11 = vmul.f32 0.044715, %v1019_v0  ;;  %v1084_v17 = vadd.f32 %v1083_v63, %v1082_v56  ;;  %v1029_v18 = vmul.f32 0.044715, %v1021_v6  ;;  %v1020_v26 = vmul.f32 %v1012_v19, %v3110_v1 }
 0x14f   : > { %v1096_v20 = vadd.f32 %v1095_v5, %v1094_v60  ;;  %v1022_v9 = vmul.f32 %v1014_v31, %v3113_v14  ;;  %v1079_v39 = vrot.slane %v1078_v23, 1  ;;  %v1091_v42 = vrot.slane %v1090_v27, 1 }
 0x150   : > { %v1035_v22 = vadd.f32 %v1027_v11, %v3092_v49  ;;  %v1037_v24 = vadd.f32 %v1029_v18, %v3098_v53  ;;  %v1085_v32 = vrot.slane %v1084_v17, 1  ;;  %v1028_v35 = vmul.f32 0.044715, %v1020_v26 }
 0x151   : > { %v1097_v36 = vrot.slane %v1096_v20, 1  ;;  %v1030_v30 = vmul.f32 0.044715, %v1022_v9  ;;  %v1080_v38 = vadd.f32 %v1079_v39, %v1078_v23  ;;  %v1092_v50 = vadd.f32 %v1091_v42, %v1090_v27 }
 0x152   : > { %v1043_v29 = vmul.f32 0.7978846, %v1035_v22  ;;  %v1045_v34 = vmul.f32 0.7978846, %v1037_v24  ;;  %v1036_v41 = vadd.f32 %v1028_v35, %v3110_v1  ;;  %v1086_v43 = vadd.f32 %v1085_v32, %v1084_v17 }
 0x153   : > { %v1098_v47 = vadd.f32 %v1097_v36, %v1096_v20  ;;  %v1038_v48 = vadd.f32 %v1030_v30, %v3113_v14  ;;  %v3129_v55 = vmul.f32 0.125, %v1080_v38  ;;  %v3131_v56 = vmul.f32 0.125, %v1092_v50 }
 0x154   : > { %2601 = vtanh.f32 %v1043_v29  ;;  %v1044_v33 = vmul.f32 0.7978846, %v1036_v41  ;;  %v3125_v52 = vmul.f32 0.125, %v1086_v43  ;;  %v1003_v63 = vmul.f32 0.5, %v3092_v49 }
 0x155   : > { %2603 = vtanh.f32 %v1045_v34  ;;  %v1046_v51 = vmul.f32 0.7978846, %v1038_v48  ;;  %v3127_v54 = vmul.f32 0.125, %v1098_v47  ;;  %v1132_v60 = vsub.f32 %v3071_v37, %v3129_v55 }
 0x156   : > { %2605 = vtanh.f32 %v1044_v33  ;;  %v1133_v57 = vsub.f32 %v3083_v44, %v3125_v52  ;;  %v1134_v62 = vsub.f32 %v3077_v28, %v3131_v56  ;;  %v1005_v3 = vmul.f32 0.5, %v3098_v53 }
 0x157   : > { %2607 = vtanh.f32 %v1046_v51  ;;  %v1135_v58 = vsub.f32 %v3089_v46, %v3127_v54  ;;  %v1140_v8 = vmul.f32 %v1132_v60, %v1132_v60  ;;  %v1004_v49 = vmul.f32 0.5, %v3110_v1 }
 0x158   : > { %v1141_v2 = vmul.f32 %v1133_v57, %v1133_v57  ;;  %v1142_v17 = vmul.f32 %v1134_v62, %v1134_v62  ;;  %v1006_v34 = vmul.f32 0.5, %v3113_v14 }
 0x159   : > { %v1143_v6 = vmul.f32 %v1135_v58, %v1135_v58  ;;  %v1148_v26 = vrot.slane %v1140_v8, 4 }
 0x15a   : > { %v1154_v19 = vrot.slane %v1141_v2, 4  ;;  %v1160_v31 = vrot.slane %v1142_v17, 4 }
 0x15b   : > { %v1166_v23 = vrot.slane %v1143_v6, 4  ;;  %v1149_v30 = vadd.f32 %v1148_v26, %v1140_v8 }
 0x15c   : > { %v1155_v36 = vadd.f32 %v1154_v19, %v1141_v2  ;;  %v1161_v47 = vadd.f32 %v1160_v31, %v1142_v17 }
 0x15d   : > { %v1167_v1 = vadd.f32 %v1166_v23, %v1143_v6  ;;  %v1150_v60 = vrot.slane %v1149_v30, 2 }
 0x15e   : > { %v1156_v50 = vrot.slane %v1155_v36, 2 }
 0x15f   : > { %v1168_v57 = vrot.slane %v1167_v1, 2 }
 0x161   : > { %v2602_v59 = vpop.eup %2601  ;;  %v1169_v8 = vadd.f32 %v1168_v57, %v1167_v1 }
 0x162   : > { %v2604_v61 = vpop.eup %2603  ;;  %v1059_v0 = vadd.f32 1.0, %v2602_v59 }
 0x163   : > { %v1061_v5 = vadd.f32 1.0, %v2604_v61  ;;  %v2606_v15 = vpop.eup %2605 }
 0x164   : > { %v3143_v7 = vmul.f32 %v1059_v0, %v1003_v63  ;;  %v1060_v22 = vadd.f32 1.0, %v2606_v15  ;;  %v2608_v24 = vpop.eup %2607  ;;  %v1162_v63 = vrot.slane %v1161_v47, 2 }
 0x165   : > { %v3145_v11 = vmul.f32 %v1061_v5, %v1005_v3  ;;  %v1062_v35 = vadd.f32 1.0, %v2608_v24  ;;  %v1157_v3 = vadd.f32 %v1156_v50, %v1155_v36 }
 0x166   : > { %v1099_v18 = vrot.slane %v3143_v7, 4  ;;  %v3152_v29 = vmul.f32 %v1060_v22, %v1004_v49  ;;  %v1163_v49 = vadd.f32 %v1162_v63, %v1161_v47 }
 0x167   : > { %v1111_v20 = vrot.slane %v3145_v11, 4  ;;  %v3156_v42 = vmul.f32 %v1062_v35, %v1006_v34 }
 0x168   : > { %v1100_v53 = vadd.f32 %v1099_v18, %v3143_v7  ;;  %v1105_v39 = vrot.slane %v3152_v29, 4  ;;  %v1151_v18 = vadd.f32 %v1150_v60, %v1149_v30 }
 0x169   : > { %v1112_v27 = vadd.f32 %v1111_v20, %v3145_v11  ;;  %v1117_v38 = vrot.slane %v3156_v42, 4 }
 0x16a   : > { %v1101_v32 = vrot.slane %v1100_v53, 2  ;;  %v1106_v33 = vadd.f32 %v1105_v39, %v3152_v29  ;;  %v1152_v34 = vrot.slane %v1151_v18, 1 }
 0x16b   : > { %v1113_v9 = vrot.slane %v1112_v27, 2  ;;  %v1118_v59 = vadd.f32 %v1117_v38, %v3156_v42 }
 0x16c   : > { %v1102_v41 = vadd.f32 %v1101_v32, %v1100_v53  ;;  %v1107_v14 = vrot.slane %v1106_v33, 2  ;;  %v1158_v53 = vrot.slane %v1157_v3, 1  ;;  %v1153_v38 = vadd.f32 %v1152_v34, %v1151_v18 }
 0x16d   : > { %v1114_v43 = vadd.f32 %v1113_v9, %v1112_v27  ;;  %v1119_v2 = vrot.slane %v1118_v59, 2  ;;  %v1170_v27 = vrot.slane %v1169_v8, 1  ;;  %v1164_v9 = vrot.slane %v1163_v49, 1 }
 0x16e   : > { %v1103_v48 = vrot.slane %v1102_v41, 1  ;;  %v1108_v62 = vadd.f32 %v1107_v14, %v1106_v33 }
 0x16f   : > { %v1115_v51 = vrot.slane %v1114_v43, 1  ;;  %v1120_v17 = vadd.f32 %v1119_v2, %v1118_v59  ;;  %v1171_v33 = vadd.f32 %v1170_v27, %v1169_v8  ;;  %v1165_v14 = vadd.f32 %v1164_v9, %v1163_v49 }
 0x170   : > { %v1104_v58 = vadd.f32 %v1103_v48, %v1102_v41  ;;  %v1109_v6 = vrot.slane %v1108_v62, 1  ;;  %v1159_v41 = vadd.f32 %v1158_v53, %v1157_v3  ;;  %v1196_v3 = vmul.f32 0.125, %v1153_v38 }
 0x171   : > { %v1116_v61 = vadd.f32 %v1115_v51, %v1114_v43  ;;  %v1121_v23 = vrot.slane %v1120_v17, 1  ;;  %v1198_v8 = vmul.f32 0.125, %v1165_v14 }
 0x172   : > { %v3161_v0 = vmul.f32 0.125, %v1104_v58  ;;  %v1110_v20 = vadd.f32 %v1109_v6, %v1108_v62  ;;  %v1197_v59 = vmul.f32 0.125, %v1159_v41  ;;  %v1199_v62 = vmul.f32 0.125, %v1171_v33 }
 0x173   : > { %v3163_v5 = vmul.f32 0.125, %v1116_v61  ;;  %v1122_v32 = vadd.f32 %v1121_v23, %v1120_v17 }
 0x174   : > { %v1136_v15 = vsub.f32 %v3143_v7, %v3161_v0  ;;  %v3169_v26 = vmul.f32 0.125, %v1110_v20  ;;  %v1205_v20 = vadd.f32 1e-05, %v1197_v59  ;;  %v1207_v23 = vadd.f32 1e-05, %v1199_v62 }
 0x175   : > { %v1138_v19 = vsub.f32 %v3145_v11, %v3163_v5  ;;  %v3173_v1 = vmul.f32 0.125, %v1122_v32 }
 0x176   : > { %v1144_v22 = vmul.f32 %v1136_v15, %v1136_v15  ;;  %v1137_v36 = vsub.f32 %v3152_v29, %v3169_v26  ;;  %2609 = vrsqrt.f32 %v1205_v20 }
 0x177   : > { %v1146_v24 = vmul.f32 %v1138_v19, %v1138_v19  ;;  %v1139_v48 = vsub.f32 %v3156_v42, %v3173_v1  ;;  %2611 = vrsqrt.f32 %v1207_v23 }
 0x178   : > { %v1172_v31 = vrot.slane %v1144_v22, 4  ;;  %v1145_v43 = vmul.f32 %v1137_v36, %v1137_v36 }
 0x179   : > { %v1184_v35 = vrot.slane %v1146_v24, 4  ;;  %v1147_v58 = vmul.f32 %v1139_v48, %v1139_v48  ;;  %v2683_v48 = vmov 1966171168  }
 0x17a   : > { %v1173_v39 = vadd.f32 %v1172_v31, %v1144_v22  ;;  %v1178_v51 = vrot.slane %v1145_v43, 4  ;;  %v1206_v31 = vadd.f32 1e-05, %v1198_v8  ;;  %v1233_v38 = vunpack.c.l.s4 %v2683_v48 }
 0x17b   : > { %v1185_v30 = vadd.f32 %v1184_v35, %v1146_v24  ;;  %v1190_v2 = vrot.slane %v1147_v58, 4  ;;  %v1204_v24 = vadd.f32 1e-05, %v1196_v3 }
 0x17c   : > { %v1174_v47 = vrot.slane %v1173_v39, 2  ;;  %v1179_v61 = vadd.f32 %v1178_v51, %v1145_v43  ;;  %v1234_v51 = vunpack.c.0.s8 %v1233_v38 }
 0x17d   : > { %v1186_v50 = vrot.slane %v1185_v30, 2  ;;  %v1191_v19 = vadd.f32 %v1190_v2, %v1147_v58  ;;  %2613 = vrsqrt.f32 %v1204_v24 }
 0x17e   : > { %v1175_v57 = vadd.f32 %v1174_v47, %v1173_v39  ;;  %v1180_v15 = vrot.slane %v1179_v61, 2  ;;  %2615 = vrsqrt.f32 %v1206_v31  ;;  %v1237_v59 = vsub.s32 %v1234_v51, %v2978_v4 }
 0x17f   : > { %v1187_v60 = vadd.f32 %v1186_v50, %v1185_v30  ;;  %v1192_v49 = vrot.slane %v1191_v19, 2 }
 0x180   : > { %v1176_v63 = vrot.slane %v1175_v57, 1  ;;  %v1181_v18 = vadd.f32 %v1180_v15, %v1179_v61 }
 0x181   : > { %v1188_v6 = vrot.slane %v1187_v60, 1  ;;  %v1193_v32 = vadd.f32 %v1192_v49, %v1191_v19  ;;  %v2334_v49 = vld [vmem:[%s2891_s15 + $0x1] ss:$4 sm:$0xff] }
 0x182   : > { %v1177_v17 = vadd.f32 %v1176_v63, %v1175_v57  ;;  %v1182_v27 = vrot.slane %v1181_v18, 1 }
 0x183   : > { %v1189_v22 = vadd.f32 %v1188_v6, %v1187_v60  ;;  %v1194_v9 = vrot.slane %v1193_v32, 1  ;;  %v2610_v50 = vpop.eup %2609 }
 0x184   : > { %v1200_v53 = vmul.f32 0.125, %v1177_v17  ;;  %v1183_v35 = vadd.f32 %v1182_v27, %v1181_v18  ;;  %v2612_v14 = vpop.eup %2611 }
 0x185   : > { %v1202_v34 = vmul.f32 0.125, %v1189_v22  ;;  %v1195_v41 = vadd.f32 %v1194_v9, %v1193_v32 }
 0x186   : > { %v1208_v36 = vadd.f32 1e-05, %v1200_v53  ;;  %v1201_v39 = vmul.f32 0.125, %v1183_v35 }
 0x187   : > { %v1210_v30 = vadd.f32 1e-05, %v1202_v34  ;;  %v1203_v33 = vmul.f32 0.125, %v1195_v41 }
 0x188   : > { %v1209_v43 = vadd.f32 1e-05, %v1201_v39  ;;  %2617 = vrsqrt.f32 %v1208_v36 }
 0x189   : > { %v1211_v47 = vadd.f32 1e-05, %v1203_v33 }
 0x18a   : > { %2619 = vrsqrt.f32 %v1209_v43  ;;  %v2614_v57 = vpop.eup %2613 }
 0x18b   : > { %2621 = vrsqrt.f32 %v1210_v30  ;;  %v2616_v58 = vpop.eup %2615  ;;  %v1228_v60 = vcombine.low %v2614_v57, %v2610_v50 }
 0x18c   : > { %2623 = vrsqrt.f32 %v1211_v47  ;;  %v1229_v61 = vcombine.low %v2616_v58, %v2612_v14 }
 0x18d   : > { %v1238_v6 = vrot.slane %v1228_v60, %v1237_v59 }
 0x18e   : > { %v1245_v15 = vrot.slane %v1229_v61, %v1237_v59 }
 0x190   : > { %v1260_v20 = vcombine.low %v1238_v6, %v1245_v15 }
 0x192   : > { %v1268_v23 = vrot.slane %v1260_v20, %v1237_v59 }
 0x195   : > { %v2618_v62 = vpop.eup %2617 }
 0x197   : > { %v2620_v63 = vpop.eup %2619 }
 0x198   : > { %v1230_v2 = vcombine.low %v2618_v62, %v2620_v63  ;;  %v2622_v3 = vpop.eup %2621 }
 0x199   : > { %v2624_v8 = vpop.eup %2623 }
 0x19a   : > { %v1252_v17 = vrot.slane %v1230_v2, %v1237_v59  ;;  %v1231_v19 = vcombine.low %v2622_v3, %v2624_v8 }
 0x19c   : > { %v1259_v22 = vrot.slane %v1231_v19, %v1237_v59 }
 0x19e   : > { %v1261_v18 = vcombine.low %v1252_v17, %v1259_v22 }
 0x1a0   : > { %v1275_v53 = vrot.slane %v1261_v18, %v1237_v59 }
 0x1a2   : > { %v1276_v24 = vcombine.low %v1268_v23, %v1275_v53 }
 0x1a4   : > { %v1278_v4 = vmul.f32 %v2334_v49, %v1276_v24  ;;  %v2566_v49 = vld [vmem:[%s2896_s23 + $0x1f0] sm:$0xff]  }
 0x1a6   : > { %v3180_v27 = vrot.slane %v1278_v4, %v3060_v21  ;;  %v1303_v31 = vrot.slane %v1278_v4, %v3075_v40  ;;  %v3184_v32 = vrot.slane %v1278_v4, %v3065_v25  ;;  %v1311_v34 = vrot.slane %v1278_v4, %v3086_v45 }
 0x1a7   : > { %v1283_v35 = vrot.slane %v1278_v4, %v2985_v10  ;;  %v1287_v36 = vrot.slane %v1278_v4, %v2994_v12  ;;  %v1291_v9 = vrot.slane %v1278_v4, %v2991_v13  ;;  %v1295_v39 = vrot.slane %v1278_v4, %v2999_v16 }
 0x1a8   : > { %v1324_v41 = vmul.f32 %v3180_v27, %v3161_v0  ;;  %v1325_v30 = vmul.f32 %v1303_v31, %v3169_v26  ;;  %v1326_v43 = vmul.f32 %v3184_v32, %v3163_v5  ;;  %v1327_v33 = vmul.f32 %v1311_v34, %v3173_v1 }
 0x1a9   : > { %v1320_v47 = vmul.f32 %v1283_v35, %v3129_v55  ;;  %v1321_v48 = vmul.f32 %v1287_v36, %v3125_v52  ;;  %v1322_v38 = vmul.f32 %v1291_v9, %v3131_v56  ;;  %v1323_v50 = vmul.f32 %v1295_v39, %v3127_v54  ;;  %v2335_v55 = vld [vmem:[%s2891_s15 + $0x2] ss:$4 sm:$0xff] }
 0x1aa   : > { %v1338_v51 = vcombine.low %v1324_v41, %v1325_v30  ;;  %v1339_v14 = vcombine.low %v1326_v43, %v1327_v33  ;;  %v1388_v52 = vmul.f32 %v1287_v36, %v3083_v44  ;;  %v1390_v54 = vmul.f32 %v1295_v39, %v3089_v46  ;;  %v2570_v36 = vld [vmem:[%s2896_s23 + $0x1e8] sm:$0xff]   ;;  %v2573_v41 = vld [vmem:[%s2896_s23 + $0x160] sm:$0xff]  }
 0x1ab   : > { %v1336_v57 = vcombine.low %v1320_v47, %v1321_v48  ;;  %v1337_v0 = vcombine.low %v1322_v38, %v1323_v50  ;;  %v1387_v56 = vmul.f32 %v1283_v35, %v3071_v37  ;;  %v1389_v6 = vmul.f32 %v1291_v9, %v3077_v28  ;;  %v2569_v35 = vld [vmem:[%s2896_s23 + $0x168] sm:$0xff]   ;;  %v2574_v30 = vld [vmem:[%s2896_s23 + $0x1e0] sm:$0xff]   ;;  %v2577_v47 = vld [vmem:[%s2896_s23 + $0x158] sm:$0xff]  }
 0x1ac   : > { %v1360_v58 = vrot.slane %v1338_v51, %v1237_v59  ;;  %v1367_v26 = vrot.slane %v1339_v14, %v1237_v59  ;;  %v1392_v44 = vmul.f32 %v1303_v31, %v3152_v29  ;;  %v1394_v28 = vmul.f32 %v1311_v34, %v3156_v42  ;;  %v2564_v42 = vld [vmem:[%s2896_s23 + $0x1b8] sm:$0xff]   ;;  %v2567_v31 = vld [vmem:[%s2896_s23 + $0x130] sm:$0xff]   ;;  %v2571_v9 = vld [vmem:[%s2896_s23 + $0x128] sm:$0xff]  }
 0x1ad   : > { %v1346_v60 = vrot.slane %v1336_v57, %v1237_v59  ;;  %v1353_v61 = vrot.slane %v1337_v0, %v1237_v59  ;;  %v2568_v34 = vld [vmem:[%s2896_s23 + $0x1b0] sm:$0xff]   ;;  %v2572_v39 = vld [vmem:[%s2896_s23 + $0x1a8] sm:$0xff]   ;;  %v2575_v43 = vld [vmem:[%s2896_s23 + $0x120] sm:$0xff]  }
 0x1ae   : > { %v1369_v5 = vcombine.low %v1360_v58, %v1367_v26  ;;  %v2576_v33 = vld [vmem:[%s2896_s23 + $0x1a0] sm:$0xff]   ;;  %v2578_v48 = vld [vmem:[%s2896_s23 + $0x1d8] sm:$0xff]   ;;  %v2581_v51 = vld [vmem:[%s2896_s23 + $0x150] sm:$0xff]  }
 0x1af   : > { %v1368_v62 = vcombine.low %v1346_v60, %v1353_v61  ;;  %v2579_v38 = vld [vmem:[%s2896_s23 + $0x118] sm:$0xff]   ;;  %v2582_v14 = vld [vmem:[%s2896_s23 + $0x1d0] sm:$0xff]   ;;  %v2585_v58 = vld [vmem:[%s2896_s23 + $0x148] sm:$0xff]  }
 0x1b0   : > { %v1383_v1 = vrot.slane %v1369_v5, %v1237_v59  ;;  %v2580_v50 = vld [vmem:[%s2896_s23 + $0x198] sm:$0xff]   ;;  %v2583_v57 = vld [vmem:[%s2896_s23 + $0x110] sm:$0xff]   ;;  %v2586_v26 = vld [vmem:[%s2896_s23 + $0x1c8] sm:$0xff]  }
 0x1b1   : > { %v1376_v63 = vrot.slane %v1368_v62, %v1237_v59  ;;  %v2584_v0 = vld [vmem:[%s2896_s23 + $0x190] sm:$0xff]   ;;  %v2587_v60 = vld [vmem:[%s2896_s23 + $0x108] sm:$0xff]   ;;  %v2589_v5 = vld [vmem:[%s2896_s23 + $0x140] sm:$0xff]  }
 0x1b2   : > { %v2588_v61 = vld [vmem:[%s2896_s23 + $0x188] sm:$0xff]   ;;  %v2590_v62 = vld [vmem:[%s2896_s23 + $0x1c0] sm:$0xff]  }
 0x1b3   : > { %v1384_v2 = vcombine.low %v1376_v63, %v1383_v1 }
 0x1b5   : > { %v3202_v3 = vsub.f32 %v2335_v55, %v1384_v2  ;;  %v1391_v55 = vmul.f32 %v3180_v27, %v3143_v7  ;;  %v1393_v2 = vmul.f32 %v3184_v32, %v3145_v11 }
 0x1b7   : > { %v1403_v15 = vrot.slane %v3202_v3, %v2994_v12  ;;  %v1411_v8 = vrot.slane %v3202_v3, %v2999_v16  ;;  %v1399_v59 = vrot.slane %v3202_v3, %v2985_v10  ;;  %v1407_v17 = vrot.slane %v3202_v3, %v2991_v13 }
 0x1b8   : > { %v1419_v37 = vrot.slane %v3202_v3, %v3075_v40  ;;  %v1427_v12 = vrot.slane %v3202_v3, %v3086_v45  ;;  %v2563_v40 = vld [vmem:[%s2896_s23 + $0x138] sm:$0xff]   ;;  %v2565_v45 = vld [vmem:[%s2896_s23 + $0x170] sm:$0xff]   ;;  %v1415_v1 = vrot.slane %v3202_v3, %v3060_v21  ;;  %v1423_v63 = vrot.slane %v3202_v3, %v3065_v25 }
 0x1b9   : > { %v1437_v16 = vadd.f32 %v1403_v15, %v1388_v52  ;;  %v1439_v46 = vadd.f32 %v1411_v8, %v1390_v54  ;;  %v1436_v19 = vadd.f32 %v1399_v59, %v1387_v56  ;;  %v1438_v20 = vadd.f32 %v1407_v17, %v1389_v6  ;;  %v2591_v52 = vld [vmem:[%s2896_s23 + $0x100] sm:$0xff]  }
 0x1ba   : > { %v1441_v22 = vadd.f32 %v1419_v37, %v1392_v44  ;;  %v1443_v18 = vadd.f32 %v1427_v12, %v1394_v28  ;;  %v2592_v54 = vld [vmem:[%s2896_s23 + $0x180] sm:$0xff]   ;;  %v1440_v56 = vadd.f32 %v1415_v1, %v1391_v55  ;;  %v1442_v6 = vadd.f32 %v1423_v63, %v1393_v2 }
 0x1bb   : > { %v1446_v13 = vpack.c.bf16 %v1437_v16, %v1437_v16  ;;  %v1448_v23 = vpack.c.bf16 %v1439_v46, %v1439_v46  ;;  %v1445_v29 = vpack.c.bf16 %v1436_v19, %v1436_v19  ;;  %v1447_v53 = vpack.c.bf16 %v1438_v20, %v1438_v20 }
 0x1bc   : > { %v1450_v24 = vpack.c.bf16 %v1441_v22, %v1441_v22  ;;  %v1452_v4 = vpack.c.bf16 %v1443_v18, %v1443_v18  ;;  %v1449_v21 = vpack.c.bf16 %v1440_v56, %v1440_v56  ;;  %v1451_v15 = vpack.c.bf16 %v1442_v6, %v1442_v6 }
 0x1bd   : > { %1997 = vmatprep.mubr.bf16.mxu0 %v1446_v13  ;;  %2037 = vmatprep.mubr.bf16.mxu1 %v1448_v23  ;;  %v1444_v23 = vld [vmem:[#allocation3] sm:$0xff] }
 0x1be   : > { %1998 = vmatmul.mubr.bf16.vlgmr.msra.gmra.mxu0 %v1445_v29  ;;  %2038 = vmatmul.mubr.bf16.vlgmr.msra.gmra.mxu1 %v1447_v53 }
 0x1bf   : > { %2452 = vmatpush3.bf16.msra.mxu0 %v2563_v40  ;;  %2474 = vmatpush3.bf16.msra.mxu1 %v2564_v42 }
 0x1c0   : > { %2077 = vmatprep.mubr.bf16.mxu0 %v1450_v24  ;;  %2117 = vmatprep.mubr.bf16.mxu1 %v1452_v4 }
 0x1c1   : > { %2453 = vmatprep.subr.bf16.mxu0 %v2565_v45  ;;  %2475 = vmatprep.subr.bf16.mxu1 %v2566_v49 }
 0x1c3   : > { %2454 = vmatpush3.bf16.msra.mxu0 %v2567_v31  ;;  %2476 = vmatpush3.bf16.msra.mxu1 %v2568_v34 }
 0x1c4   : > { %2455 = vmatprep.subr.bf16.mxu0 %v2569_v35  ;;  %2477 = vmatprep.subr.bf16.mxu1 %v2570_v36 }
 0x1c7   : > { %2456 = vmatpush3.bf16.msra.mxu0 %v2571_v9  ;;  %2478 = vmatpush3.bf16.msra.mxu1 %v2572_v39 }
 0x1c8   : > { %2457 = vmatprep.subr.bf16.mxu0 %v2573_v41  ;;  %2479 = vmatprep.subr.bf16.mxu1 %v2574_v30 }
 0x1cb   : > { %2458 = vmatpush3.bf16.msra.mxu0 %v2575_v43  ;;  %2480 = vmatpush3.bf16.msra.mxu1 %v2576_v33 }
 0x1cc   : > { %2459 = vmatprep.subr.bf16.mxu0 %v2577_v47  ;;  %2481 = vmatprep.subr.bf16.mxu1 %v2578_v48 }
 0x1cf   : > { %2460 = vmatpush3.bf16.msra.mxu0 %v2579_v38  ;;  %2482 = vmatpush3.bf16.msra.mxu1 %v2580_v50 }
 0x1d0   : > { %2461 = vmatprep.subr.bf16.mxu0 %v2581_v51  ;;  %2483 = vmatprep.subr.bf16.mxu1 %v2582_v14 }
 0x1d3   : > { %2462 = vmatpush3.bf16.msra.mxu0 %v2583_v57  ;;  %2484 = vmatpush3.bf16.msra.mxu1 %v2584_v0 }
 0x1d4   : > { %2463 = vmatprep.subr.bf16.mxu0 %v2585_v58  ;;  %2485 = vmatprep.subr.bf16.mxu1 %v2586_v26 }
 0x1d7   : > { %2464 = vmatpush3.bf16.msra.mxu0 %v2587_v60  ;;  %2486 = vmatpush3.bf16.msra.mxu1 %v2588_v61 }
 0x1d8   : > { %2465 = vmatprep.subr.bf16.mxu0 %v2589_v5  ;;  %2487 = vmatprep.subr.bf16.mxu1 %v2590_v62 }
 0x1db   : > { %2466 = vmatpush3.bf16.msra.mxu0 %v2591_v52  ;;  %2488 = vmatpush3.bf16.msra.mxu1 %v2592_v54 }
 0x1de   : > { %2078 = vmatmul.mubr.bf16.vlgmr.msra.gmra.mxu0 %v1449_v21  ;;  %2118 = vmatmul.mubr.bf16.vlgmr.msra.gmra.mxu1 %v1451_v15 }
 0x27e   : > { %v2423_v25 = vpop.f32.mrf.mxu0  ;;  %v2445_v3 = vpop.f32.mrf.mxu1 }
 0x280   : > { %v2424_v7 = vpop.f32.mrf.mxu0  ;;  %v2446_v27 = vpop.f32.mrf.mxu1 }
 0x281   : > { %v2425_v17 = vadd.f32 %v2424_v7, %v2423_v25  ;;  %v2447_v44 = vadd.f32 %v2446_v27, %v2445_v3 }
 0x282   : > { %v2426_v8 = vpop.f32.mrf.mxu0  ;;  %v2448_v11 = vpop.f32.mrf.mxu1 }
 0x283   : > { %v2040_v46 = vadd.f32 %v2447_v44, %v2425_v17 }
 0x284   : > { %v2427_v32 = vpop.f32.mrf.mxu0  ;;  %v2449_v59 = vpop.f32.mrf.mxu1 }
 0x29e   : > { %v2467_v37 = vpop.f32.mrf.mxu0  ;;  %v2489_v28 = vpop.f32.mrf.mxu1 }
 0x2a0   : > { %v2468_v12 = vpop.f32.mrf.mxu0  ;;  %v2490_v16 = vpop.f32.mrf.mxu1 }
 0x2a1   : > { %v2469_v19 = vadd.f32 %v2468_v12, %v2467_v37  ;;  %v2491_v13 = vadd.f32 %v2490_v16, %v2489_v28 }
 0x2a2   : > { %v2470_v20 = vpop.f32.mrf.mxu0  ;;  %v2492_v22 = vpop.f32.mrf.mxu1 }
 0x2a3   : > { %v2080_v18 = vadd.f32 %v2469_v19, %v2040_v46 }
 0x2a4   : > { %v2471_v29 = vpop.f32.mrf.mxu0  ;;  %v2493_v53 = vpop.f32.mrf.mxu1 }
 0x2a5   : > { %v2120_v40 = vadd.f32 %v2491_v13, %v2080_v18  ;;  %2130 = sbr.rel (%p2400_p11) target bundleno = 778 (0x30a), region = 71 }
 0x2a7   : > { %v2125_v42 = vadd.f32 %v2120_v40, %v1444_v23 }
 0x2a9   : > { %2126 = vst [vmem:[#allocation3] sm:$0xff] %v2125_v42 }
 0x2aa   : > { %v2401_v49 = vld [vmem:[%s3298_s4] ss:$0 sm:$0xff]  ;;  %v2147_v63 = vld [vmem:[%s3298_s4 + $0x1] sm:$0x1]  ;;  %v2148_v52 = vld [vmem:[%s3298_s4 + $0x2] sm:$0x1] }
 0x2b0   : > { %v2131_v45 = vld [vmem:[#allocation3] sm:$0xff] }
 0x2b1   : > { %v2137_v24 = vadd.f32 %v2401_v49, %v2131_v45 }
 0x2b3   : > { %v2139_v4 = vmul.f32 %v2137_v24, %v2137_v24  ;;  %v2138_v9 = vmul.f32 0.5, %v2137_v24 }
 0x2b5   : > { %v2140_v31 = vmul.f32 %v2139_v4, %v2137_v24 }
 0x2b7   : > { %v2141_v34 = vmul.f32 0.044715, %v2140_v31 }
 0x2b9   : > { %v2142_v35 = vadd.f32 %v2141_v34, %v2137_v24 }
 0x2bb   : > { %v2143_v36 = vmul.f32 0.7978846, %v2142_v35 }
 0x2bd   : > { %2625 = vtanh.f32 %v2143_v36 }
 0x2ca   : > { %v2626_v39 = vpop.eup %2625 }
 0x2cb   : > { %v2145_v41 = vadd.f32 1.0, %v2626_v39 }
 0x2cd   : > { %v2146_v30 = vmul.f32 %v2145_v41, %v2138_v9 }
 0x2cf   : > { %v2149_v43 = vrot.slane %v2146_v30, 4 }
 0x2d1   : > { %v2150_v33 = vadd.f32 %v2149_v43, %v2146_v30 }
 0x2d3   : > { %v2151_v47 = vrot.slane %v2150_v33, 2 }
 0x2d5   : > { %v2152_v48 = vadd.f32 %v2151_v47, %v2150_v33 }
 0x2d7   : > { %v2153_v38 = vrot.slane %v2152_v48, 1 }
 0x2d9   : > { %v2154_v50 = vadd.f32 %v2153_v38, %v2152_v48 }
 0x2db   : > { %v2155_v51 = vmul.f32 0.125, %v2154_v50 }
 0x2dd   : > { %v2156_v14 = vsub.f32 %v2146_v30, %v2155_v51 }
 0x2df   : > { %v2157_v57 = vmul.f32 %v2156_v14, %v2156_v14 }
 0x2e1   : > { %v2158_v0 = vrot.slane %v2157_v57, 4 }
 0x2e3   : > { %v2159_v58 = vadd.f32 %v2158_v0, %v2157_v57 }
 0x2e5   : > { %v2160_v26 = vrot.slane %v2159_v58, 2 }
 0x2e7   : > { %v2161_v60 = vadd.f32 %v2160_v26, %v2159_v58 }
 0x2e9   : > { %v2162_v61 = vrot.slane %v2161_v60, 1 }
 0x2eb   : > { %v2163_v5 = vadd.f32 %v2162_v61, %v2161_v60 }
 0x2ed   : > { %v2164_v62 = vmul.f32 0.125, %v2163_v5 }
 0x2ef   : > { %v2165_v1 = vadd.f32 1e-05, %v2164_v62 }
 0x2f1   : > { %2627 = vrsqrt.f32 %v2165_v1 }
 0x2fe   : > { %v2628_v55 = vpop.eup %2627 }
 0x2ff   : > { %v2167_v2 = vmul.f32 %v2628_v55, %v2147_v63 }
 0x301   : > { %v2168_v54 = vmul.f32 %v2167_v2, %v2155_v51  ;;  %v2173_v56 = vrot.slane %v2167_v2, %v2985_v10 }
 0x303   : > { %v2169_v6 = vsub.f32 %v2148_v52, %v2168_v54  ;;  %v2174_v21 = vmul.f32 %v2173_v56, %v2146_v30 }
 0x305   : > { %v2178_v15 = vrot.slane %v2169_v6, %v2985_v10 }
 0x307   : > { %v2179_v25 = vadd.f32 %v2178_v15, %v2174_v21 }
 0x309   : > { %2180 = vst [vmem:[#allocation3] sm:$0xff] %v2179_v25 }
 0x30a PF: > { %p2499_p12 = scmp.eq.s32.totalorder %s2731_s21, 1  ;;  %s2684_s8 = smov [#allocation3]  }
 0x30b   : > { %s2188_s9 = sshll.u32 %s2684_s8, 4  ;;  %s2189_s9 = int_to_ptr.vmem [resolvable:$true] %s2188_s9 }
 0x30c   : > { %s2629_s10 = scalar_lea.vmem %s2189_s9, 128  ;;  %p2636_p2 = scmp.lt.s32.totalorder %s2189_s9, %s2189_s9 }
 0x30d   : > { %p2630_p13 = scmp.ne.s32.totalorder %s2189_s9, %s2629_s10  ;;  %p2637_p3 = scmp.lt.s32.totalorder %s2629_s10, %s2629_s10 }
 0x30f   : > { %p2631_p0 = pnand %p2630_p13, %p2499_p12  ;;  %p2638_p4 = por %p2637_p3, %p2636_p2 }
 0x311   : > { %p2632_p1 = pneg %p2631_p0 }
 0x313   : > { %p2639_p5 = pnand %p2638_p4, %p2632_p1 }
 0x315   : > { %2642 = shalt.err (!%p2639_p5)
}
 0x316   : > { %2496 = dma.vmem_to_hbm [thread:$0]  (%p2499_p12), %s2189_s9, 128, %s3299_s5, [#allocation4]  }
 0x317   : > { %2666 = dma.done.wait (%p2499_p12), [#allocation4], 128  }
 0x318   : > { %2668 = vsyncadd (%p2499_p12), [#allocation4], 4294967168 }
 0x319 PF: > { %p13_p6 = scmp.ge.s32.totalorder %s2734_s22, 4   ;;  %s3300_s18 = smov %s2675_s19 }
 0x31a   : > { %s3301_s19 = smov %s2743_s25  ;;  %s3302_s20 = smov %s2734_s22 }
 0x31b   :  { %15 = sbr.rel (!%p13_p6) target bundleno = 2 (0x2), region = 111 }
 0x320   :  { %2201 = vsyncpa [#allocation4], 1 }
 0x321   :  { %2203 = vsyncpa [#allocation4 + $0x1], 1 }

</bundles_post_ra>
